<compile_context>
chip_gen: v7x
topology: tpu7x:2x2x1
jax: 0.10.0
libtpu: 0.0.40
codegen_flags: <defaults>
</compile_context>

<pallas_src>
import math
from functools import partial

import jax
import jax.numpy as jnp
from jax import lax
from jax.experimental import pallas as pl
from jax.experimental.pallas import tpu as pltpu

_SQRT_2_OVER_PI = math.sqrt(2.0 / math.pi)
_LN_EPS = 1e-5


def _layer_norm(x, gamma, beta):
    mu = jnp.mean(x, axis=-1, keepdims=True)
    xc = x - mu
    var = jnp.mean(xc * xc, axis=-1, keepdims=True)
    return xc * lax.rsqrt(var + _LN_EPS) * gamma + beta


def _new_gelu(x):
    return 0.5 * x * (1.0 + jnp.tanh(_SQRT_2_OVER_PI * (x + 0.044715 * x * x * x)))


def _block_kernel(x_ref,
                  g1_ref, b1_ref,
                  wqkv_ref, bqkv_ref, wpr_ref, bpr_ref,
                  g2_ref, b2_ref,
                  wfc_ref, bfc_ref, wp2_ref, bp2_ref,
                  o_ref,
                  y_scratch,
                  *, num_heads, seq_len, scale):
    R, C = x_ref.shape          # R = (batches in this grid step) * seq_len
    T = seq_len
    BB = R // T
    hd = C // num_heads

    x = x_ref[...].astype(jnp.float32)                                   # (R, C)

    # ---- LayerNorm 1 (f32 VPU math) ----------------------------------------
    h1 = _layer_norm(x, g1_ref[...], b1_ref[...])

    # ---- fused QKV projection for all rows in this step (one MXU matmul) ---
    qkv = jnp.dot(h1, wqkv_ref[...],
                  preferred_element_type=jnp.float32) + bqkv_ref[...]    # (R, 3C)

    # ---- causal self-attention ---------------------------------------------
    row = lax.broadcasted_iota(jnp.int32, (T, T), 0)
    col = lax.broadcasted_iota(jnp.int32, (T, T), 1)
    causal_bias = jnp.where(col <= row, 0.0, -1e30).astype(jnp.float32)  # additive mask

    nt_dims = (((1,), (1,)), ((), ()))   # contract last dims: q @ k.T (no transpose op)

    # Static loops are fine at 2 batches x 4 heads; at real head counts move
    # the head loop to a grid axis / lax.fori_loop (see TODO at top of file).
    for b in range(BB):
        r0 = b * T
        for h in range(num_heads):
            c0 = h * hd
            q_h = qkv[r0:r0 + T, 0 * C + c0: 0 * C + c0 + hd]            # (T, hd)
            k_h = qkv[r0:r0 + T, 1 * C + c0: 1 * C + c0 + hd]
            v_h = qkv[r0:r0 + T, 2 * C + c0: 2 * C + c0 + hd]

            s = lax.dot_general(q_h, k_h, nt_dims,
                                preferred_element_type=jnp.float32) * scale
            s = s + causal_bias
            s = s - jnp.max(s, axis=-1, keepdims=True)
            p = jnp.exp(s)
            p = p / jnp.sum(p, axis=-1, keepdims=True)    # exact divide (EUP + Newton)
            # TODO(synk): attn_dropout / resid_dropout are identity at inference.

            y_h = jnp.dot(p, v_h, preferred_element_type=jnp.float32)    # (T, hd)
            # Head merge: write into the lane slice of the (R, C) scratch;
            # the output projection below is then ONE full-K matmul.
            y_scratch[r0:r0 + T, c0:c0 + hd] = y_h

    attn = jnp.dot(y_scratch[...], wpr_ref[...],
                   preferred_element_type=jnp.float32) + bpr_ref[...]    # (R, C)
    x1 = x + attn                                                        # residual 1

    # ---- LayerNorm 2 + MLP (c_fc -> NewGELU -> c_proj) ----------------------
    h2 = _layer_norm(x1, g2_ref[...], b2_ref[...])
    hfc = jnp.dot(h2, wfc_ref[...],
                  preferred_element_type=jnp.float32) + bfc_ref[...]     # (R, 4C)
    act = _new_gelu(hfc)
    mlp = jnp.dot(act, wp2_ref[...],
                  preferred_element_type=jnp.float32) + bp2_ref[...]     # (R, C)

    o_ref[...] = (x1 + mlp).astype(o_ref.dtype)                          # residual 2


def gpt_block(x, params, num_heads):
    (g1, b1, w_attn, b_attn, w_proj, b_proj,
     g2, b2, w_fc, b_fc, w_proj2, b_proj2) = params
    B, T, C = x.shape
    scale = 1.0 * math.sqrt(C // num_heads)   # reference *multiplies* by sqrt(head_dim)

    # Fold batch into the matmul M dimension.  Row tiles must hold whole
    # sequences (attention needs all T rows of a batch), targeting ~256 rows
    # per step.  At toy sizes this gives a single grid step (no pointless
    # serialization on single-TC v5e/v6e); at real sizes it yields many small
    # 'parallel' steps that pipeline and split across v7x's two TensorCores.
    target_rows = 256
    b_per_step = max(1, min(B, max(1, target_rows // T)))
    while B % b_per_step != 0:
        b_per_step -= 1
    G = B // b_per_step
    R = b_per_step * T
    x2d = x.reshape(B * T, C)

    const2d = lambda shape: pl.BlockSpec(shape, lambda i: (0, 0))   # resident weights
    kernel = partial(_block_kernel, num_heads=num_heads, seq_len=T, scale=scale)

    out2d = pl.pallas_call(
        kernel,
        out_shape=jax.ShapeDtypeStruct((B * T, C), x.dtype),
        grid=(G,),
        in_specs=[
            pl.BlockSpec((R, C), lambda i: (i, 0)),       # x rows for this step
            const2d((1, C)), const2d((1, C)),             # ln_1 gamma / beta
            const2d((C, 3 * C)), const2d((1, 3 * C)),     # c_attn  W / b
            const2d((C, C)), const2d((1, C)),             # attn c_proj W / b
            const2d((1, C)), const2d((1, C)),             # ln_2 gamma / beta
            const2d((C, 4 * C)), const2d((1, 4 * C)),     # mlp c_fc W / b
            const2d((4 * C, C)), const2d((1, C)),         # mlp c_proj W / b
        ],
        out_specs=pl.BlockSpec((R, C), lambda i: (i, 0)),
        scratch_shapes=[pltpu.VMEM((R, C), jnp.float32)],  # per-step attention output
        compiler_params=pltpu.CompilerParams(
            dimension_semantics=("parallel",)),
    )(x2d, g1, b1, w_attn, b_attn, w_proj, b_proj,
      g2, b2, w_fc, b_fc, w_proj2, b_proj2)
    return out2d.reshape(B, T, C)


def reference(x, params, num_heads):
    """Plain-JAX replica of the PyTorch Block forward (eval mode)."""
    (g1, b1, w_attn, b_attn, w_proj, b_proj,
     g2, b2, w_fc, b_fc, w_proj2, b_proj2) = params
    B, T, C = x.shape
    hd = C // num_heads

    def ln(z, g, bb):
        mu = z.mean(-1, keepdims=True)
        var = ((z - mu) ** 2).mean(-1, keepdims=True)
        return (z - mu) / jnp.sqrt(var + _LN_EPS) * g[0] + bb[0]

    h = ln(x, g1, b1)
    qkv = h @ w_attn + b_attn[0]
    q, k, v = qkv[..., :C], qkv[..., C:2 * C], qkv[..., 2 * C:]
    q = q.reshape(B, T, num_heads, hd).transpose(0, 2, 1, 3)
    k = k.reshape(B, T, num_heads, hd).transpose(0, 2, 1, 3)
    v = v.reshape(B, T, num_heads, hd).transpose(0, 2, 1, 3)
    att = jnp.einsum('bhtd,bhsd->bhts', q, k) * (1.0 * math.sqrt(hd))
    mask = jnp.tril(jnp.ones((T, T), dtype=bool))
    att = jnp.where(mask[None, None], att, -jnp.inf)
    att = jax.nn.softmax(att, axis=-1)
    y = jnp.einsum('bhts,bhsd->bhtd', att, v)
    y = y.transpose(0, 2, 1, 3).reshape(B, T, C)
    x1 = x + (y @ w_proj + b_proj[0])

    h2 = ln(x1, g2, b2)
    hfc = h2 @ w_fc + b_fc[0]
    gelu = 0.5 * hfc * (1.0 + jnp.tanh(_SQRT_2_OVER_PI * (hfc + 0.044715 * hfc ** 3)))
    return x1 + (gelu @ w_proj2 + b_proj2[0])


if __name__ == "__main__":
    # config: embed_size=32, head_size (= number of heads)=4, block_size >= T=8
    B, T, C, num_heads = 2, 8, 32, 4

    key = jax.random.PRNGKey(0)
    keys = jax.random.split(key, 13)
    x = jax.random.normal(keys[0], (B, T, C), jnp.float32)

    g1 = 1.0 + 0.1 * jax.random.normal(keys[1], (1, C), jnp.float32)
    b1 = 0.1 * jax.random.normal(keys[2], (1, C), jnp.float32)
    w_attn = jax.random.normal(keys[3], (C, 3 * C), jnp.float32) / math.sqrt(C)
    b_attn = 0.01 * jax.random.normal(keys[4], (1, 3 * C), jnp.float32)
    w_proj = jax.random.normal(keys[5], (C, C), jnp.float32) / math.sqrt(C)
    b_proj = 0.01 * jax.random.normal(keys[6], (1, C), jnp.float32)
    g2 = 1.0 + 0.1 * jax.random.normal(keys[7], (1, C), jnp.float32)
    b2 = 0.1 * jax.random.normal(keys[8], (1, C), jnp.float32)
    w_fc = jax.random.normal(keys[9], (C, 4 * C), jnp.float32) / math.sqrt(C)
    b_fc = 0.01 * jax.random.normal(keys[10], (1, 4 * C), jnp.float32)
    w_proj2 = jax.random.normal(keys[11], (4 * C, C), jnp.float32) / math.sqrt(4 * C)
    b_proj2 = 0.01 * jax.random.normal(keys[12], (1, C), jnp.float32)

    params = (g1, b1, w_attn, b_attn, w_proj, b_proj,
              g2, b2, w_fc, b_fc, w_proj2, b_proj2)

    out = gpt_block(x, params, num_heads)
    out = jax.block_until_ready(out)

    ref = reference(x, params, num_heads)
    assert out.shape == (B, T, C)
    max_err = jnp.max(jnp.abs(out - ref))
    assert jnp.allclose(out, ref, atol=2e-3, rtol=2e-3), \
        f"Pallas output mismatch vs reference (max abs err = {max_err})"
    print("KERNEL_OK")
</pallas_src>

<mosaic_0001>
module attributes {stable_mosaic.version = 11 : i64} {
  func.func @_block_kernel(%arg0: i32, %arg1: memref<16x32xf32, #tpu.memory_space<vmem>>, %arg2: memref<1x32xf32, #tpu.memory_space<vmem>>, %arg3: memref<1x32xf32, #tpu.memory_space<vmem>>, %arg4: memref<32x96xf32, #tpu.memory_space<vmem>>, %arg5: memref<1x96xf32, #tpu.memory_space<vmem>>, %arg6: memref<32x32xf32, #tpu.memory_space<vmem>>, %arg7: memref<1x32xf32, #tpu.memory_space<vmem>>, %arg8: memref<1x32xf32, #tpu.memory_space<vmem>>, %arg9: memref<1x32xf32, #tpu.memory_space<vmem>>, %arg10: memref<32x128xf32, #tpu.memory_space<vmem>>, %arg11: memref<1x128xf32, #tpu.memory_space<vmem>>, %arg12: memref<128x32xf32, #tpu.memory_space<vmem>>, %arg13: memref<1x32xf32, #tpu.memory_space<vmem>>, %arg14: memref<16x32xf32, #tpu.memory_space<vmem>>, %arg15: memref<16x32xf32, #tpu.memory_space<vmem>>) attributes {dimension_semantics = [#tpu.dimension_semantics<parallel>], iteration_bounds = array<i64: 1>, scalar_prefetch = 0 : i64, scratch_operands = 1 : i64, tpu.core_type = #tpu.core_type<tc>, window_params = [{transform_indices = @transform_0, window_bounds = array<i64: 16, 32>}, {pipeline_mode = #tpu.pipeline_mode<synchronous>, transform_indices = @transform_1, window_bounds = array<i64: 1, 32>}, {pipeline_mode = #tpu.pipeline_mode<synchronous>, transform_indices = @transform_2, window_bounds = array<i64: 1, 32>}, {pipeline_mode = #tpu.pipeline_mode<synchronous>, transform_indices = @transform_3, window_bounds = array<i64: 32, 96>}, {pipeline_mode = #tpu.pipeline_mode<synchronous>, transform_indices = @transform_4, window_bounds = array<i64: 1, 96>}, {pipeline_mode = #tpu.pipeline_mode<synchronous>, transform_indices = @transform_5, window_bounds = array<i64: 32, 32>}, {pipeline_mode = #tpu.pipeline_mode<synchronous>, transform_indices = @transform_6, window_bounds = array<i64: 1, 32>}, {pipeline_mode = #tpu.pipeline_mode<synchronous>, transform_indices = @transform_7, window_bounds = array<i64: 1, 32>}, {pipeline_mode = #tpu.pipeline_mode<synchronous>, transform_indices = @transform_8, window_bounds = array<i64: 1, 32>}, {pipeline_mode = #tpu.pipeline_mode<synchronous>, transform_indices = @transform_9, window_bounds = array<i64: 32, 128>}, {pipeline_mode = #tpu.pipeline_mode<synchronous>, transform_indices = @transform_10, window_bounds = array<i64: 1, 128>}, {pipeline_mode = #tpu.pipeline_mode<synchronous>, transform_indices = @transform_11, window_bounds = array<i64: 128, 32>}, {pipeline_mode = #tpu.pipeline_mode<synchronous>, transform_indices = @transform_12, window_bounds = array<i64: 1, 32>}, {transform_indices = @transform_13, window_bounds = array<i64: 16, 32>}]} {
    %c0 = arith.constant 0 : index
    %c0_0 = arith.constant 0 : index
    %0 = vector.load %arg1[%c0, %c0_0] : memref<16x32xf32, #tpu.memory_space<vmem>>, vector<16x32xf32>
    %c0_1 = arith.constant 0 : index
    %c0_2 = arith.constant 0 : index
    %1 = vector.load %arg2[%c0_1, %c0_2] : memref<1x32xf32, #tpu.memory_space<vmem>>, vector<1x32xf32>
    %c0_3 = arith.constant 0 : index
    %c0_4 = arith.constant 0 : index
    %2 = vector.load %arg3[%c0_3, %c0_4] : memref<1x32xf32, #tpu.memory_space<vmem>>, vector<1x32xf32>
    %cst = arith.constant dense<0.000000e+00> : vector<16xf32>
    %3 = vector.multi_reduction <add>, %0, %cst [1] : vector<16x32xf32> to vector<16xf32>
    %4 = vector.shape_cast %3 : vector<16xf32> to vector<16x1xf32>
    %cst_5 = arith.constant 3.200000e+01 : f32
    %5 = vector.broadcast %cst_5 : f32 to vector<16x1xf32>
    %6 = arith.divf %4, %5 : vector<16x1xf32>
    %7 = vector.broadcast %6 : vector<16x1xf32> to vector<16x32xf32>
    %8 = arith.subf %0, %7 : vector<16x32xf32>
    %9 = arith.mulf %8, %8 : vector<16x32xf32>
    %cst_6 = arith.constant dense<0.000000e+00> : vector<16xf32>
    %10 = vector.multi_reduction <add>, %9, %cst_6 [1] : vector<16x32xf32> to vector<16xf32>
    %11 = vector.shape_cast %10 : vector<16xf32> to vector<16x1xf32>
    %cst_7 = arith.constant 3.200000e+01 : f32
    %12 = vector.broadcast %cst_7 : f32 to vector<16x1xf32>
    %13 = arith.divf %11, %12 : vector<16x1xf32>
    %cst_8 = arith.constant 9.99999974E-6 : f32
    %14 = vector.broadcast %cst_8 : f32 to vector<16x1xf32>
    %15 = arith.addf %13, %14 : vector<16x1xf32>
    %16 = math.rsqrt %15 : vector<16x1xf32>
    %17 = vector.broadcast %16 : vector<16x1xf32> to vector<16x32xf32>
    %18 = arith.mulf %8, %17 : vector<16x32xf32>
    %19 = vector.broadcast %1 : vector<1x32xf32> to vector<16x32xf32>
    %20 = arith.mulf %18, %19 : vector<16x32xf32>
    %21 = vector.broadcast %2 : vector<1x32xf32> to vector<16x32xf32>
    %22 = arith.addf %20, %21 : vector<16x32xf32>
    %c0_9 = arith.constant 0 : index
    %c0_10 = arith.constant 0 : index
    %23 = vector.load %arg4[%c0_9, %c0_10] : memref<32x96xf32, #tpu.memory_space<vmem>>, vector<32x96xf32>
    %cst_11 = arith.constant dense<0.000000e+00> : vector<16x96xf32>
    %24 = tpu.matmul %22, %23, %cst_11 {dimension_numbers = #tpu.dot_dimension_numbers<[1], [0], [0], [1], [0, 0, 1, 1], [], []>} : vector<16x32xf32>, vector<32x96xf32>, vector<16x96xf32> -> vector<16x96xf32>
    %c0_12 = arith.constant 0 : index
    %c0_13 = arith.constant 0 : index
    %25 = vector.load %arg5[%c0_12, %c0_13] : memref<1x96xf32, #tpu.memory_space<vmem>>, vector<1x96xf32>
    %26 = vector.broadcast %25 : vector<1x96xf32> to vector<16x96xf32>
    %27 = arith.addf %24, %26 : vector<16x96xf32>
    %28 = tpu.iota {dimensions = array<i32: 0>} : vector<8x8xi32>
    %29 = tpu.iota {dimensions = array<i32: 1>} : vector<8x8xi32>
    %30 = arith.cmpi sle, %29, %28 : vector<8x8xi32>
    %cst_14 = arith.constant 0.000000e+00 : f32
    %cst_15 = arith.constant -1.000000e+30 : f32
    %31 = vector.broadcast %cst_14 : f32 to vector<8x8xf32>
    %32 = vector.broadcast %cst_15 : f32 to vector<8x8xf32>
    %33 = arith.select %30, %31, %32 : vector<8x8xi1>, vector<8x8xf32>
    %34 = vector.extract_strided_slice %27 {offsets = [0, 0], sizes = [8, 8], strides = [1, 1]} : vector<16x96xf32> to vector<8x8xf32>
    %35 = vector.extract_strided_slice %27 {offsets = [0, 32], sizes = [8, 8], strides = [1, 1]} : vector<16x96xf32> to vector<8x8xf32>
    %36 = vector.extract_strided_slice %27 {offsets = [0, 64], sizes = [8, 8], strides = [1, 1]} : vector<16x96xf32> to vector<8x8xf32>
    %cst_16 = arith.constant dense<0.000000e+00> : vector<8x8xf32>
    %37 = tpu.matmul %34, %35, %cst_16 {dimension_numbers = #tpu.dot_dimension_numbers<[1], [1], [0], [0], [0, 0, 1, 0], [], []>} : vector<8x8xf32>, vector<8x8xf32>, vector<8x8xf32> -> vector<8x8xf32>
    %cst_17 = arith.constant 2.82842708 : f32
    %38 = vector.broadcast %cst_17 : f32 to vector<8x8xf32>
    %39 = arith.mulf %37, %38 : vector<8x8xf32>
    %40 = arith.addf %39, %33 : vector<8x8xf32>
    %cst_18 = arith.constant dense<0xFF800000> : vector<8xf32>
    %41 = vector.multi_reduction <maximumf>, %40, %cst_18 [1] : vector<8x8xf32> to vector<8xf32>
    %42 = vector.shape_cast %41 : vector<8xf32> to vector<8x1xf32>
    %43 = vector.broadcast %42 : vector<8x1xf32> to vector<8x8xf32>
    %44 = arith.subf %40, %43 : vector<8x8xf32>
    %45 = math.exp %44 : vector<8x8xf32>
    %cst_19 = arith.constant dense<0.000000e+00> : vector<8xf32>
    %46 = vector.multi_reduction <add>, %45, %cst_19 [1] : vector<8x8xf32> to vector<8xf32>
    %47 = vector.shape_cast %46 : vector<8xf32> to vector<8x1xf32>
    %48 = vector.broadcast %47 : vector<8x1xf32> to vector<8x8xf32>
    %49 = arith.divf %45, %48 : vector<8x8xf32>
    %cst_20 = arith.constant dense<0.000000e+00> : vector<8x8xf32>
    %50 = tpu.matmul %49, %36, %cst_20 {dimension_numbers = #tpu.dot_dimension_numbers<[1], [0], [0], [1], [0, 0, 1, 1], [], []>} : vector<8x8xf32>, vector<8x8xf32>, vector<8x8xf32> -> vector<8x8xf32>
    %c0_21 = arith.constant 0 : index
    %c0_22 = arith.constant 0 : index
    %51 = vector.load %arg15[%c0_21, %c0_22] : memref<16x32xf32, #tpu.memory_space<vmem>>, vector<8x8xf32>
    tpu.vector_store %arg15[%c0_21, %c0_22], %50 {strides = array<i32>} : memref<16x32xf32, #tpu.memory_space<vmem>>, vector<8x8xf32>,
    %52 = vector.extract_strided_slice %27 {offsets = [0, 8], sizes = [8, 8], strides = [1, 1]} : vector<16x96xf32> to vector<8x8xf32>
    %53 = vector.extract_strided_slice %27 {offsets = [0, 40], sizes = [8, 8], strides = [1, 1]} : vector<16x96xf32> to vector<8x8xf32>
    %54 = vector.extract_strided_slice %27 {offsets = [0, 72], sizes = [8, 8], strides = [1, 1]} : vector<16x96xf32> to vector<8x8xf32>
    %cst_23 = arith.constant dense<0.000000e+00> : vector<8x8xf32>
    %55 = tpu.matmul %52, %53, %cst_23 {dimension_numbers = #tpu.dot_dimension_numbers<[1], [1], [0], [0], [0, 0, 1, 0], [], []>} : vector<8x8xf32>, vector<8x8xf32>, vector<8x8xf32> -> vector<8x8xf32>
    %cst_24 = arith.constant 2.82842708 : f32
    %56 = vector.broadcast %cst_24 : f32 to vector<8x8xf32>
    %57 = arith.mulf %55, %56 : vector<8x8xf32>
    %58 = arith.addf %57, %33 : vector<8x8xf32>
    %cst_25 = arith.constant dense<0xFF800000> : vector<8xf32>
    %59 = vector.multi_reduction <maximumf>, %58, %cst_25 [1] : vector<8x8xf32> to vector<8xf32>
    %60 = vector.shape_cast %59 : vector<8xf32> to vector<8x1xf32>
    %61 = vector.broadcast %60 : vector<8x1xf32> to vector<8x8xf32>
    %62 = arith.subf %58, %61 : vector<8x8xf32>
    %63 = math.exp %62 : vector<8x8xf32>
    %cst_26 = arith.constant dense<0.000000e+00> : vector<8xf32>
    %64 = vector.multi_reduction <add>, %63, %cst_26 [1] : vector<8x8xf32> to vector<8xf32>
    %65 = vector.shape_cast %64 : vector<8xf32> to vector<8x1xf32>
    %66 = vector.broadcast %65 : vector<8x1xf32> to vector<8x8xf32>
    %67 = arith.divf %63, %66 : vector<8x8xf32>
    %cst_27 = arith.constant dense<0.000000e+00> : vector<8x8xf32>
    %68 = tpu.matmul %67, %54, %cst_27 {dimension_numbers = #tpu.dot_dimension_numbers<[1], [0], [0], [1], [0, 0, 1, 1], [], []>} : vector<8x8xf32>, vector<8x8xf32>, vector<8x8xf32> -> vector<8x8xf32>
    %c0_28 = arith.constant 0 : index
    %c8 = arith.constant 8 : index
    %69 = vector.load %arg15[%c0_28, %c8] : memref<16x32xf32, #tpu.memory_space<vmem>>, vector<8x8xf32>
    tpu.vector_store %arg15[%c0_28, %c8], %68 {strides = array<i32>} : memref<16x32xf32, #tpu.memory_space<vmem>>, vector<8x8xf32>,
    %70 = vector.extract_strided_slice %27 {offsets = [0, 16], sizes = [8, 8], strides = [1, 1]} : vector<16x96xf32> to vector<8x8xf32>
    %71 = vector.extract_strided_slice %27 {offsets = [0, 48], sizes = [8, 8], strides = [1, 1]} : vector<16x96xf32> to vector<8x8xf32>
    %72 = vector.extract_strided_slice %27 {offsets = [0, 80], sizes = [8, 8], strides = [1, 1]} : vector<16x96xf32> to vector<8x8xf32>
    %cst_29 = arith.constant dense<0.000000e+00> : vector<8x8xf32>
    %73 = tpu.matmul %70, %71, %cst_29 {dimension_numbers = #tpu.dot_dimension_numbers<[1], [1], [0], [0], [0, 0, 1, 0], [], []>} : vector<8x8xf32>, vector<8x8xf32>, vector<8x8xf32> -> vector<8x8xf32>
    %cst_30 = arith.constant 2.82842708 : f32
    %74 = vector.broadcast %cst_30 : f32 to vector<8x8xf32>
    %75 = arith.mulf %73, %74 : vector<8x8xf32>
    %76 = arith.addf %75, %33 : vector<8x8xf32>
    %cst_31 = arith.constant dense<0xFF800000> : vector<8xf32>
    %77 = vector.multi_reduction <maximumf>, %76, %cst_31 [1] : vector<8x8xf32> to vector<8xf32>
    %78 = vector.shape_cast %77 : vector<8xf32> to vector<8x1xf32>
    %79 = vector.broadcast %78 : vector<8x1xf32> to vector<8x8xf32>
    %80 = arith.subf %76, %79 : vector<8x8xf32>
    %81 = math.exp %80 : vector<8x8xf32>
    %cst_32 = arith.constant dense<0.000000e+00> : vector<8xf32>
    %82 = vector.multi_reduction <add>, %81, %cst_32 [1] : vector<8x8xf32> to vector<8xf32>
    %83 = vector.shape_cast %82 : vector<8xf32> to vector<8x1xf32>
    %84 = vector.broadcast %83 : vector<8x1xf32> to vector<8x8xf32>
    %85 = arith.divf %81, %84 : vector<8x8xf32>
    %cst_33 = arith.constant dense<0.000000e+00> : vector<8x8xf32>
    %86 = tpu.matmul %85, %72, %cst_33 {dimension_numbers = #tpu.dot_dimension_numbers<[1], [0], [0], [1], [0, 0, 1, 1], [], []>} : vector<8x8xf32>, vector<8x8xf32>, vector<8x8xf32> -> vector<8x8xf32>
    %c0_34 = arith.constant 0 : index
    %c16 = arith.constant 16 : index
    %87 = vector.load %arg15[%c0_34, %c16] : memref<16x32xf32, #tpu.memory_space<vmem>>, vector<8x8xf32>
    tpu.vector_store %arg15[%c0_34, %c16], %86 {strides = array<i32>} : memref<16x32xf32, #tpu.memory_space<vmem>>, vector<8x8xf32>,
    %88 = vector.extract_strided_slice %27 {offsets = [0, 24], sizes = [8, 8], strides = [1, 1]} : vector<16x96xf32> to vector<8x8xf32>
    %89 = vector.extract_strided_slice %27 {offsets = [0, 56], sizes = [8, 8], strides = [1, 1]} : vector<16x96xf32> to vector<8x8xf32>
    %90 = vector.extract_strided_slice %27 {offsets = [0, 88], sizes = [8, 8], strides = [1, 1]} : vector<16x96xf32> to vector<8x8xf32>
    %cst_35 = arith.constant dense<0.000000e+00> : vector<8x8xf32>
    %91 = tpu.matmul %88, %89, %cst_35 {dimension_numbers = #tpu.dot_dimension_numbers<[1], [1], [0], [0], [0, 0, 1, 0], [], []>} : vector<8x8xf32>, vector<8x8xf32>, vector<8x8xf32> -> vector<8x8xf32>
    %cst_36 = arith.constant 2.82842708 : f32
    %92 = vector.broadcast %cst_36 : f32 to vector<8x8xf32>
    %93 = arith.mulf %91, %92 : vector<8x8xf32>
    %94 = arith.addf %93, %33 : vector<8x8xf32>
    %cst_37 = arith.constant dense<0xFF800000> : vector<8xf32>
    %95 = vector.multi_reduction <maximumf>, %94, %cst_37 [1] : vector<8x8xf32> to vector<8xf32>
    %96 = vector.shape_cast %95 : vector<8xf32> to vector<8x1xf32>
    %97 = vector.broadcast %96 : vector<8x1xf32> to vector<8x8xf32>
    %98 = arith.subf %94, %97 : vector<8x8xf32>
    %99 = math.exp %98 : vector<8x8xf32>
    %cst_38 = arith.constant dense<0.000000e+00> : vector<8xf32>
    %100 = vector.multi_reduction <add>, %99, %cst_38 [1] : vector<8x8xf32> to vector<8xf32>
    %101 = vector.shape_cast %100 : vector<8xf32> to vector<8x1xf32>
    %102 = vector.broadcast %101 : vector<8x1xf32> to vector<8x8xf32>
    %103 = arith.divf %99, %102 : vector<8x8xf32>
    %cst_39 = arith.constant dense<0.000000e+00> : vector<8x8xf32>
    %104 = tpu.matmul %103, %90, %cst_39 {dimension_numbers = #tpu.dot_dimension_numbers<[1], [0], [0], [1], [0, 0, 1, 1], [], []>} : vector<8x8xf32>, vector<8x8xf32>, vector<8x8xf32> -> vector<8x8xf32>
    %c0_40 = arith.constant 0 : index
    %c24 = arith.constant 24 : index
    %105 = vector.load %arg15[%c0_40, %c24] : memref<16x32xf32, #tpu.memory_space<vmem>>, vector<8x8xf32>
    tpu.vector_store %arg15[%c0_40, %c24], %104 {strides = array<i32>} : memref<16x32xf32, #tpu.memory_space<vmem>>, vector<8x8xf32>,
    %106 = vector.extract_strided_slice %27 {offsets = [8, 0], sizes = [8, 8], strides = [1, 1]} : vector<16x96xf32> to vector<8x8xf32>
    %107 = vector.extract_strided_slice %27 {offsets = [8, 32], sizes = [8, 8], strides = [1, 1]} : vector<16x96xf32> to vector<8x8xf32>
    %108 = vector.extract_strided_slice %27 {offsets = [8, 64], sizes = [8, 8], strides = [1, 1]} : vector<16x96xf32> to vector<8x8xf32>
    %cst_41 = arith.constant dense<0.000000e+00> : vector<8x8xf32>
    %109 = tpu.matmul %106, %107, %cst_41 {dimension_numbers = #tpu.dot_dimension_numbers<[1], [1], [0], [0], [0, 0, 1, 0], [], []>} : vector<8x8xf32>, vector<8x8xf32>, vector<8x8xf32> -> vector<8x8xf32>
    %cst_42 = arith.constant 2.82842708 : f32
    %110 = vector.broadcast %cst_42 : f32 to vector<8x8xf32>
    %111 = arith.mulf %109, %110 : vector<8x8xf32>
    %112 = arith.addf %111, %33 : vector<8x8xf32>
    %cst_43 = arith.constant dense<0xFF800000> : vector<8xf32>
    %113 = vector.multi_reduction <maximumf>, %112, %cst_43 [1] : vector<8x8xf32> to vector<8xf32>
    %114 = vector.shape_cast %113 : vector<8xf32> to vector<8x1xf32>
    %115 = vector.broadcast %114 : vector<8x1xf32> to vector<8x8xf32>
    %116 = arith.subf %112, %115 : vector<8x8xf32>
    %117 = math.exp %116 : vector<8x8xf32>
    %cst_44 = arith.constant dense<0.000000e+00> : vector<8xf32>
    %118 = vector.multi_reduction <add>, %117, %cst_44 [1] : vector<8x8xf32> to vector<8xf32>
    %119 = vector.shape_cast %118 : vector<8xf32> to vector<8x1xf32>
    %120 = vector.broadcast %119 : vector<8x1xf32> to vector<8x8xf32>
    %121 = arith.divf %117, %120 : vector<8x8xf32>
    %cst_45 = arith.constant dense<0.000000e+00> : vector<8x8xf32>
    %122 = tpu.matmul %121, %108, %cst_45 {dimension_numbers = #tpu.dot_dimension_numbers<[1], [0], [0], [1], [0, 0, 1, 1], [], []>} : vector<8x8xf32>, vector<8x8xf32>, vector<8x8xf32> -> vector<8x8xf32>
    %c8_46 = arith.constant 8 : index
    %c0_47 = arith.constant 0 : index
    %123 = vector.load %arg15[%c8_46, %c0_47] : memref<16x32xf32, #tpu.memory_space<vmem>>, vector<8x8xf32>
    tpu.vector_store %arg15[%c8_46, %c0_47], %122 {strides = array<i32>} : memref<16x32xf32, #tpu.memory_space<vmem>>, vector<8x8xf32>,
    %124 = vector.extract_strided_slice %27 {offsets = [8, 8], sizes = [8, 8], strides = [1, 1]} : vector<16x96xf32> to vector<8x8xf32>
    %125 = vector.extract_strided_slice %27 {offsets = [8, 40], sizes = [8, 8], strides = [1, 1]} : vector<16x96xf32> to vector<8x8xf32>
    %126 = vector.extract_strided_slice %27 {offsets = [8, 72], sizes = [8, 8], strides = [1, 1]} : vector<16x96xf32> to vector<8x8xf32>
    %cst_48 = arith.constant dense<0.000000e+00> : vector<8x8xf32>
    %127 = tpu.matmul %124, %125, %cst_48 {dimension_numbers = #tpu.dot_dimension_numbers<[1], [1], [0], [0], [0, 0, 1, 0], [], []>} : vector<8x8xf32>, vector<8x8xf32>, vector<8x8xf32> -> vector<8x8xf32>
    %cst_49 = arith.constant 2.82842708 : f32
    %128 = vector.broadcast %cst_49 : f32 to vector<8x8xf32>
    %129 = arith.mulf %127, %128 : vector<8x8xf32>
    %130 = arith.addf %129, %33 : vector<8x8xf32>
    %cst_50 = arith.constant dense<0xFF800000> : vector<8xf32>
    %131 = vector.multi_reduction <maximumf>, %130, %cst_50 [1] : vector<8x8xf32> to vector<8xf32>
    %132 = vector.shape_cast %131 : vector<8xf32> to vector<8x1xf32>
    %133 = vector.broadcast %132 : vector<8x1xf32> to vector<8x8xf32>
    %134 = arith.subf %130, %133 : vector<8x8xf32>
    %135 = math.exp %134 : vector<8x8xf32>
    %cst_51 = arith.constant dense<0.000000e+00> : vector<8xf32>
    %136 = vector.multi_reduction <add>, %135, %cst_51 [1] : vector<8x8xf32> to vector<8xf32>
    %137 = vector.shape_cast %136 : vector<8xf32> to vector<8x1xf32>
    %138 = vector.broadcast %137 : vector<8x1xf32> to vector<8x8xf32>
    %139 = arith.divf %135, %138 : vector<8x8xf32>
    %cst_52 = arith.constant dense<0.000000e+00> : vector<8x8xf32>
    %140 = tpu.matmul %139, %126, %cst_52 {dimension_numbers = #tpu.dot_dimension_numbers<[1], [0], [0], [1], [0, 0, 1, 1], [], []>} : vector<8x8xf32>, vector<8x8xf32>, vector<8x8xf32> -> vector<8x8xf32>
    %c8_53 = arith.constant 8 : index
    %c8_54 = arith.constant 8 : index
    %141 = vector.load %arg15[%c8_53, %c8_54] : memref<16x32xf32, #tpu.memory_space<vmem>>, vector<8x8xf32>
    tpu.vector_store %arg15[%c8_53, %c8_54], %140 {strides = array<i32>} : memref<16x32xf32, #tpu.memory_space<vmem>>, vector<8x8xf32>,
    %142 = vector.extract_strided_slice %27 {offsets = [8, 16], sizes = [8, 8], strides = [1, 1]} : vector<16x96xf32> to vector<8x8xf32>
    %143 = vector.extract_strided_slice %27 {offsets = [8, 48], sizes = [8, 8], strides = [1, 1]} : vector<16x96xf32> to vector<8x8xf32>
    %144 = vector.extract_strided_slice %27 {offsets = [8, 80], sizes = [8, 8], strides = [1, 1]} : vector<16x96xf32> to vector<8x8xf32>
    %cst_55 = arith.constant dense<0.000000e+00> : vector<8x8xf32>
    %145 = tpu.matmul %142, %143, %cst_55 {dimension_numbers = #tpu.dot_dimension_numbers<[1], [1], [0], [0], [0, 0, 1, 0], [], []>} : vector<8x8xf32>, vector<8x8xf32>, vector<8x8xf32> -> vector<8x8xf32>
    %cst_56 = arith.constant 2.82842708 : f32
    %146 = vector.broadcast %cst_56 : f32 to vector<8x8xf32>
    %147 = arith.mulf %145, %146 : vector<8x8xf32>
    %148 = arith.addf %147, %33 : vector<8x8xf32>
    %cst_57 = arith.constant dense<0xFF800000> : vector<8xf32>
    %149 = vector.multi_reduction <maximumf>, %148, %cst_57 [1] : vector<8x8xf32> to vector<8xf32>
    %150 = vector.shape_cast %149 : vector<8xf32> to vector<8x1xf32>
    %151 = vector.broadcast %150 : vector<8x1xf32> to vector<8x8xf32>
    %152 = arith.subf %148, %151 : vector<8x8xf32>
    %153 = math.exp %152 : vector<8x8xf32>
    %cst_58 = arith.constant dense<0.000000e+00> : vector<8xf32>
    %154 = vector.multi_reduction <add>, %153, %cst_58 [1] : vector<8x8xf32> to vector<8xf32>
    %155 = vector.shape_cast %154 : vector<8xf32> to vector<8x1xf32>
    %156 = vector.broadcast %155 : vector<8x1xf32> to vector<8x8xf32>
    %157 = arith.divf %153, %156 : vector<8x8xf32>
    %cst_59 = arith.constant dense<0.000000e+00> : vector<8x8xf32>
    %158 = tpu.matmul %157, %144, %cst_59 {dimension_numbers = #tpu.dot_dimension_numbers<[1], [0], [0], [1], [0, 0, 1, 1], [], []>} : vector<8x8xf32>, vector<8x8xf32>, vector<8x8xf32> -> vector<8x8xf32>
    %c8_60 = arith.constant 8 : index
    %c16_61 = arith.constant 16 : index
    %159 = vector.load %arg15[%c8_60, %c16_61] : memref<16x32xf32, #tpu.memory_space<vmem>>, vector<8x8xf32>
    tpu.vector_store %arg15[%c8_60, %c16_61], %158 {strides = array<i32>} : memref<16x32xf32, #tpu.memory_space<vmem>>, vector<8x8xf32>,
    %160 = vector.extract_strided_slice %27 {offsets = [8, 24], sizes = [8, 8], strides = [1, 1]} : vector<16x96xf32> to vector<8x8xf32>
    %161 = vector.extract_strided_slice %27 {offsets = [8, 56], sizes = [8, 8], strides = [1, 1]} : vector<16x96xf32> to vector<8x8xf32>
    %162 = vector.extract_strided_slice %27 {offsets = [8, 88], sizes = [8, 8], strides = [1, 1]} : vector<16x96xf32> to vector<8x8xf32>
    %cst_62 = arith.constant dense<0.000000e+00> : vector<8x8xf32>
    %163 = tpu.matmul %160, %161, %cst_62 {dimension_numbers = #tpu.dot_dimension_numbers<[1], [1], [0], [0], [0, 0, 1, 0], [], []>} : vector<8x8xf32>, vector<8x8xf32>, vector<8x8xf32> -> vector<8x8xf32>
    %cst_63 = arith.constant 2.82842708 : f32
    %164 = vector.broadcast %cst_63 : f32 to vector<8x8xf32>
    %165 = arith.mulf %163, %164 : vector<8x8xf32>
    %166 = arith.addf %165, %33 : vector<8x8xf32>
    %cst_64 = arith.constant dense<0xFF800000> : vector<8xf32>
    %167 = vector.multi_reduction <maximumf>, %166, %cst_64 [1] : vector<8x8xf32> to vector<8xf32>
    %168 = vector.shape_cast %167 : vector<8xf32> to vector<8x1xf32>
    %169 = vector.broadcast %168 : vector<8x1xf32> to vector<8x8xf32>
    %170 = arith.subf %166, %169 : vector<8x8xf32>
    %171 = math.exp %170 : vector<8x8xf32>
    %cst_65 = arith.constant dense<0.000000e+00> : vector<8xf32>
    %172 = vector.multi_reduction <add>, %171, %cst_65 [1] : vector<8x8xf32> to vector<8xf32>
    %173 = vector.shape_cast %172 : vector<8xf32> to vector<8x1xf32>
    %174 = vector.broadcast %173 : vector<8x1xf32> to vector<8x8xf32>
    %175 = arith.divf %171, %174 : vector<8x8xf32>
    %cst_66 = arith.constant dense<0.000000e+00> : vector<8x8xf32>
    %176 = tpu.matmul %175, %162, %cst_66 {dimension_numbers = #tpu.dot_dimension_numbers<[1], [0], [0], [1], [0, 0, 1, 1], [], []>} : vector<8x8xf32>, vector<8x8xf32>, vector<8x8xf32> -> vector<8x8xf32>
    %c8_67 = arith.constant 8 : index
    %c24_68 = arith.constant 24 : index
    %177 = vector.load %arg15[%c8_67, %c24_68] : memref<16x32xf32, #tpu.memory_space<vmem>>, vector<8x8xf32>
    tpu.vector_store %arg15[%c8_67, %c24_68], %176 {strides = array<i32>} : memref<16x32xf32, #tpu.memory_space<vmem>>, vector<8x8xf32>,
    %c0_69 = arith.constant 0 : index
    %c0_70 = arith.constant 0 : index
    %178 = vector.load %arg15[%c0_69, %c0_70] : memref<16x32xf32, #tpu.memory_space<vmem>>, vector<16x32xf32>
    %c0_71 = arith.constant 0 : index
    %c0_72 = arith.constant 0 : index
    %179 = vector.load %arg6[%c0_71, %c0_72] : memref<32x32xf32, #tpu.memory_space<vmem>>, vector<32x32xf32>
    %cst_73 = arith.constant dense<0.000000e+00> : vector<16x32xf32>
    %180 = tpu.matmul %178, %179, %cst_73 {dimension_numbers = #tpu.dot_dimension_numbers<[1], [0], [0], [1], [0, 0, 1, 1], [], []>} : vector<16x32xf32>, vector<32x32xf32>, vector<16x32xf32> -> vector<16x32xf32>
    %c0_74 = arith.constant 0 : index
    %c0_75 = arith.constant 0 : index
    %181 = vector.load %arg7[%c0_74, %c0_75] : memref<1x32xf32, #tpu.memory_space<vmem>>, vector<1x32xf32>
    %182 = vector.broadcast %181 : vector<1x32xf32> to vector<16x32xf32>
    %183 = arith.addf %180, %182 : vector<16x32xf32>
    %184 = arith.addf %0, %183 : vector<16x32xf32>
    %c0_76 = arith.constant 0 : index
    %c0_77 = arith.constant 0 : index
    %185 = vector.load %arg8[%c0_76, %c0_77] : memref<1x32xf32, #tpu.memory_space<vmem>>, vector<1x32xf32>
    %c0_78 = arith.constant 0 : index
    %c0_79 = arith.constant 0 : index
    %186 = vector.load %arg9[%c0_78, %c0_79] : memref<1x32xf32, #tpu.memory_space<vmem>>, vector<1x32xf32>
    %cst_80 = arith.constant dense<0.000000e+00> : vector<16xf32>
    %187 = vector.multi_reduction <add>, %184, %cst_80 [1] : vector<16x32xf32> to vector<16xf32>
    %188 = vector.shape_cast %187 : vector<16xf32> to vector<16x1xf32>
    %cst_81 = arith.constant 3.200000e+01 : f32
    %189 = vector.broadcast %cst_81 : f32 to vector<16x1xf32>
    %190 = arith.divf %188, %189 : vector<16x1xf32>
    %191 = vector.broadcast %190 : vector<16x1xf32> to vector<16x32xf32>
    %192 = arith.subf %184, %191 : vector<16x32xf32>
    %193 = arith.mulf %192, %192 : vector<16x32xf32>
    %cst_82 = arith.constant dense<0.000000e+00> : vector<16xf32>
    %194 = vector.multi_reduction <add>, %193, %cst_82 [1] : vector<16x32xf32> to vector<16xf32>
    %195 = vector.shape_cast %194 : vector<16xf32> to vector<16x1xf32>
    %cst_83 = arith.constant 3.200000e+01 : f32
    %196 = vector.broadcast %cst_83 : f32 to vector<16x1xf32>
    %197 = arith.divf %195, %196 : vector<16x1xf32>
    %cst_84 = arith.constant 9.99999974E-6 : f32
    %198 = vector.broadcast %cst_84 : f32 to vector<16x1xf32>
    %199 = arith.addf %197, %198 : vector<16x1xf32>
    %200 = math.rsqrt %199 : vector<16x1xf32>
    %201 = vector.broadcast %200 : vector<16x1xf32> to vector<16x32xf32>
    %202 = arith.mulf %192, %201 : vector<16x32xf32>
    %203 = vector.broadcast %185 : vector<1x32xf32> to vector<16x32xf32>
    %204 = arith.mulf %202, %203 : vector<16x32xf32>
    %205 = vector.broadcast %186 : vector<1x32xf32> to vector<16x32xf32>
    %206 = arith.addf %204, %205 : vector<16x32xf32>
    %c0_85 = arith.constant 0 : index
    %c0_86 = arith.constant 0 : index
    %207 = vector.load %arg10[%c0_85, %c0_86] : memref<32x128xf32, #tpu.memory_space<vmem>>, vector<32x128xf32>
    %cst_87 = arith.constant dense<0.000000e+00> : vector<16x128xf32>
    %208 = tpu.matmul %206, %207, %cst_87 {dimension_numbers = #tpu.dot_dimension_numbers<[1], [0], [0], [1], [0, 0, 1, 1], [], []>} : vector<16x32xf32>, vector<32x128xf32>, vector<16x128xf32> -> vector<16x128xf32>
    %c0_88 = arith.constant 0 : index
    %c0_89 = arith.constant 0 : index
    %209 = vector.load %arg11[%c0_88, %c0_89] : memref<1x128xf32, #tpu.memory_space<vmem>>, vector<1x128xf32>
    %210 = vector.broadcast %209 : vector<1x128xf32> to vector<16x128xf32>
    %211 = arith.addf %208, %210 : vector<16x128xf32>
    %cst_90 = arith.constant 5.000000e-01 : f32
    %212 = vector.broadcast %cst_90 : f32 to vector<16x128xf32>
    %213 = arith.mulf %212, %211 : vector<16x128xf32>
    %cst_91 = arith.constant 4.471500e-02 : f32
    %214 = vector.broadcast %cst_91 : f32 to vector<16x128xf32>
    %215 = arith.mulf %214, %211 : vector<16x128xf32>
    %216 = arith.mulf %215, %211 : vector<16x128xf32>
    %217 = arith.mulf %216, %211 : vector<16x128xf32>
    %218 = arith.addf %211, %217 : vector<16x128xf32>
    %cst_92 = arith.constant 0.797884583 : f32
    %219 = vector.broadcast %cst_92 : f32 to vector<16x128xf32>
    %220 = arith.mulf %219, %218 : vector<16x128xf32>
    %221 = math.tanh %220 : vector<16x128xf32>
    %cst_93 = arith.constant 1.000000e+00 : f32
    %222 = vector.broadcast %cst_93 : f32 to vector<16x128xf32>
    %223 = arith.addf %222, %221 : vector<16x128xf32>
    %224 = arith.mulf %213, %223 : vector<16x128xf32>
    %c0_94 = arith.constant 0 : index
    %c0_95 = arith.constant 0 : index
    %225 = vector.load %arg12[%c0_94, %c0_95] : memref<128x32xf32, #tpu.memory_space<vmem>>, vector<128x32xf32>
    %cst_96 = arith.constant dense<0.000000e+00> : vector<16x32xf32>
    %226 = tpu.matmul %224, %225, %cst_96 {dimension_numbers = #tpu.dot_dimension_numbers<[1], [0], [0], [1], [0, 0, 1, 1], [], []>} : vector<16x128xf32>, vector<128x32xf32>, vector<16x32xf32> -> vector<16x32xf32>
    %c0_97 = arith.constant 0 : index
    %c0_98 = arith.constant 0 : index
    %227 = vector.load %arg13[%c0_97, %c0_98] : memref<1x32xf32, #tpu.memory_space<vmem>>, vector<1x32xf32>
    %228 = vector.broadcast %227 : vector<1x32xf32> to vector<16x32xf32>
    %229 = arith.addf %226, %228 : vector<16x32xf32>
    %230 = arith.addf %184, %229 : vector<16x32xf32>
    %c0_99 = arith.constant 0 : index
    %c0_100 = arith.constant 0 : index
    %231 = vector.load %arg14[%c0_99, %c0_100] : memref<16x32xf32, #tpu.memory_space<vmem>>, vector<16x32xf32>
    tpu.vector_store %arg14[%c0_99, %c0_100], %230 {strides = array<i32>} : memref<16x32xf32, #tpu.memory_space<vmem>>, vector<16x32xf32>,
    return
  }
  func.func @transform_0(%arg0: i32) -> (i32, i32) {
    %c0_i32 = arith.constant 0 : i32
    %c0_i32_0 = arith.constant 0 : i32
    return %arg0, %c0_i32 : i32, i32
  }
  func.func @transform_1(%arg0: i32) -> (i32, i32) {
    %c0_i32 = arith.constant 0 : i32
    %c0_i32_0 = arith.constant 0 : i32
    %c0_i32_1 = arith.constant 0 : i32
    return %c0_i32, %c0_i32_0 : i32, i32
  }
  func.func @transform_2(%arg0: i32) -> (i32, i32) {
    %c0_i32 = arith.constant 0 : i32
    %c0_i32_0 = arith.constant 0 : i32
    %c0_i32_1 = arith.constant 0 : i32
    return %c0_i32, %c0_i32_0 : i32, i32
  }
  func.func @transform_3(%arg0: i32) -> (i32, i32) {
    %c0_i32 = arith.constant 0 : i32
    %c0_i32_0 = arith.constant 0 : i32
    %c0_i32_1 = arith.constant 0 : i32
    return %c0_i32, %c0_i32_0 : i32, i32
  }
  func.func @transform_4(%arg0: i32) -> (i32, i32) {
    %c0_i32 = arith.constant 0 : i32
    %c0_i32_0 = arith.constant 0 : i32
    %c0_i32_1 = arith.constant 0 : i32
    return %c0_i32, %c0_i32_0 : i32, i32
  }
  func.func @transform_5(%arg0: i32) -> (i32, i32) {
    %c0_i32 = arith.constant 0 : i32
    %c0_i32_0 = arith.constant 0 : i32
    %c0_i32_1 = arith.constant 0 : i32
    return %c0_i32, %c0_i32_0 : i32, i32
  }
  func.func @transform_6(%arg0: i32) -> (i32, i32) {
    %c0_i32 = arith.constant 0 : i32
    %c0_i32_0 = arith.constant 0 : i32
    %c0_i32_1 = arith.constant 0 : i32
    return %c0_i32, %c0_i32_0 : i32, i32
  }
  func.func @transform_7(%arg0: i32) -> (i32, i32) {
    %c0_i32 = arith.constant 0 : i32
    %c0_i32_0 = arith.constant 0 : i32
    %c0_i32_1 = arith.constant 0 : i32
    return %c0_i32, %c0_i32_0 : i32, i32
  }
  func.func @transform_8(%arg0: i32) -> (i32, i32) {
    %c0_i32 = arith.constant 0 : i32
    %c0_i32_0 = arith.constant 0 : i32
    %c0_i32_1 = arith.constant 0 : i32
    return %c0_i32, %c0_i32_0 : i32, i32
  }
  func.func @transform_9(%arg0: i32) -> (i32, i32) {
    %c0_i32 = arith.constant 0 : i32
    %c0_i32_0 = arith.constant 0 : i32
    %c0_i32_1 = arith.constant 0 : i32
    return %c0_i32, %c0_i32_0 : i32, i32
  }
  func.func @transform_10(%arg0: i32) -> (i32, i32) {
    %c0_i32 = arith.constant 0 : i32
    %c0_i32_0 = arith.constant 0 : i32
    %c0_i32_1 = arith.constant 0 : i32
    return %c0_i32, %c0_i32_0 : i32, i32
  }
  func.func @transform_11(%arg0: i32) -> (i32, i32) {
    %c0_i32 = arith.constant 0 : i32
    %c0_i32_0 = arith.constant 0 : i32
    %c0_i32_1 = arith.constant 0 : i32
    return %c0_i32, %c0_i32_0 : i32, i32
  }
  func.func @transform_12(%arg0: i32) -> (i32, i32) {
    %c0_i32 = arith.constant 0 : i32
    %c0_i32_0 = arith.constant 0 : i32
    %c0_i32_1 = arith.constant 0 : i32
    return %c0_i32, %c0_i32_0 : i32, i32
  }
  func.func @transform_13(%arg0: i32) -> (i32, i32) {
    %c0_i32 = arith.constant 0 : i32
    %c0_i32_0 = arith.constant 0 : i32
    return %arg0, %c0_i32 : i32, i32
  }
}

</mosaic_0001>

<bundles_post_ra>
// kernel: tpu_custom_call.1
= control target key start
LH: loop header
LB: loop body
LE: loop exit
PB: predicated region body
PF: predicated region fallthrough
CT: control target
= control target key end

     0   :  { %vm49_vm0 = vcmask 261120   ;;  %s2726_s0 = inlined_call_operand.vmem [shape: f32[16,32], index: 0, kind: input, shape index: {}]   ;;  %s2727_s1 = inlined_call_operand.vmem [shape: f32[1,32], index: 1, kind: input, shape index: {}]   ;;  %s2728_s2 = inlined_call_operand.vmem [shape: f32[1,32], index: 2, kind: input, shape index: {}]   ;;  %s2729_s3 = inlined_call_operand.vmem [shape: f32[32,96], index: 3, kind: input, shape index: {}]   ;;  %s2730_s4 = inlined_call_operand.vmem [shape: f32[1,96], index: 4, kind: input, shape index: {}]   ;;  %s2731_s5 = inlined_call_operand.vmem [shape: f32[32,32], index: 5, kind: input, shape index: {}]   ;;  %s2732_s6 = inlined_call_operand.vmem [shape: f32[1,32], index: 6, kind: input, shape index: {}]   ;;  %s2733_s7 = inlined_call_operand.vmem [shape: f32[1,32], index: 7, kind: input, shape index: {}]   ;;  %s2734_s8 = inlined_call_operand.vmem [shape: f32[1,32], index: 8, kind: input, shape index: {}]   ;;  %s2735_s9 = inlined_call_operand.vmem [shape: f32[32,128], index: 9, kind: input, shape index: {}]   ;;  %s2736_s10 = inlined_call_operand.vmem [shape: f32[1,128], index: 10, kind: input, shape index: {}]   ;;  %s2737_s11 = inlined_call_operand.vmem [shape: f32[128,32], index: 11, kind: input, shape index: {}]   ;;  %s2738_s12 = inlined_call_operand.vmem [shape: f32[1,32], index: 12, kind: input, shape index: {}]   ;;  %s2739_s13 = inlined_call_operand.hbm [shape: f32[16,32], index: 13, kind: output, shape index: {}]  }
   0x1   :  { %v2418_v0 = vld [vmem:[%s2726_s0] sm:$0xff]  ;;  %v2423_v1 = vld [vmem:[%s2726_s0 + $0x8] sm:$0xff] }
   0x2   :  { %18 = vsyncpa [#allocation4], 0  ;;  %v50_v2 = vsel %vm49_vm0, %v2418_v0, 0.0  ;;  %v53_v3 = vsel %vm49_vm0, %v2423_v1, 0.0  ;;  %v93_v14 = vld [vmem:[%s2729_s3] sm:$0xff]  ;;  %v94_v15 = vld [vmem:[%s2729_s3 + $0x8] sm:$0xff]  ;;  %v185_v56 = vlaneseq }
   0x3   :  { %51 = vadd.xlane.f32.xlu0 %v50_v2  ;;  %v95_v16 = vld [vmem:[%s2729_s3 + $0x10] sm:$0xff]  ;;  %v2183_v17 = vpack.c.bf16 %v94_v15, %v93_v14  ;;  %v96_v18 = vld [vmem:[%s2729_s3 + $0x18] sm:$0xff]  ;;  %v1929_v27 = vld [vmem:[%s2727_s1] ss:$0 sm:$0xff]  ;;  %v2326_v36 = vmov 0.0   ;;  %vm2327_vm1 = vmmov 0  }
   0x4   :  { %v2187_v19 = vpack.c.bf16 %v96_v18, %v95_v16  ;;  %v1930_v29 = vld [vmem:[%s2728_s2] ss:$0 sm:$0xff]  ;;  %2056 = vmatprep.subr.mxu0 %v2326_v36  ;;  %2058 = vmatprep.mubr.msk.f32.mxu0 %vm2327_vm1, %v2326_v36  ;;  %s2328_s22 = smov 88   ;;  %s2329_s23 = smov 96   ;;  %vm194_vm2 = vcmask 64512   ;;  %v186_v57 = vshrl.u32 %v185_v56, 7 }
   0x5   :  { %2184 = vmatprep.subr.bf16.mxu1 %v2183_v17  ;;  %v1931_v37 = vld [vmem:[%s2730_s4] ss:$0 sm:$0xff]  ;;  %s2330_s24 = smov 120   ;;  %s2331_s25 = smov 112   ;;  %v188_v58 = vand.u32 127, %v185_v56  ;;  %vm530_vm4 = vcmask 130112  }
   0x6   :  { %2186 = vmatpush3.bf16.msra.mxu1 %v2183_v17  ;;  %s2332_s26 = smov 80   ;;  %s2333_s4 = smov 104   ;;  %v2335_v60 = vmov -1e+30   ;;  %vm703_vm5 = vcmask 195712   ;;  %vm876_vm6 = vcmask 261312  }
   0x7   :  { %54 = vadd.xlane.f32.xlu0 %v53_v3  ;;  %2188 = vmatprep.subr.bf16.mxu1 %v2187_v19  ;;  %s2334_s27 = smov 72   ;;  %vm189_vm3 = vcmp.le.s32.totalorder %v188_v58, %v186_v57  ;;  %s2336_s28 = smov 64  }
   0x8   :  { %v190_v61 = vsel %vm189_vm3, 0.0, %v2335_v60  ;;  %s2337_s0 = smov 48   ;;  %s2338_s29 = smov 40  }
   0x9   :  { %s2339_s30 = smov 56   ;;  %s2340_s14 = smov 8  }
   0xa   :  { %2190 = vmatpush3.bf16.msra.mxu1 %v2187_v19  ;;  %s2341_s15 = smov 16   ;;  %s2342_s16 = smov 24  }
   0xb   :  { %2046 = vmatprep.subr.mxu1 %v2326_v36 }
  0x90   :  { %v52_v4 = vpop.xlane.xlu0 %51 }
  0x91   :  { %v57_v5 = vmul.f32 0.03125, %v52_v4 }
  0x93   :  { %v59_v6 = vsub.f32 %v2418_v0, %v57_v5 }
  0x94   :  { %v55_v7 = vpop.xlane.xlu0 %54 }
  0x95   :  { %v58_v8 = vmul.f32 0.03125, %v55_v7  ;;  %v61_v9 = vmul.f32 %v59_v6, %v59_v6 }
  0x97   :  { %v60_v10 = vsub.f32 %v2423_v1, %v58_v8  ;;  %v63_v11 = vsel %vm49_vm0, %v61_v9, 0.0 }
  0x98   :  { %64 = vadd.xlane.f32.xlu1 %v63_v11 }
  0x99   :  { %v62_v12 = vmul.f32 %v60_v10, %v60_v10 }
  0x9b   :  { %v66_v13 = vsel %vm49_vm0, %v62_v12, 0.0 }
  0x9c   :  { %67 = vadd.xlane.f32.xlu1 %v66_v13 }
 0x125   :  { %v65_v20 = vpop.xlane.xlu1 %64 }
 0x126   :  { %v69_v21 = vmul.f32 0.03125, %v65_v20 }
 0x128   :  { %v71_v22 = vadd.f32 1e-05, %v69_v21 }
 0x129   :  { %v68_v23 = vpop.xlane.xlu1 %67 }
 0x12a   :  { %2258 = vrsqrt.f32 %v71_v22  ;;  %v70_v24 = vmul.f32 0.03125, %v68_v23 }
 0x12c   :  { %v72_v25 = vadd.f32 1e-05, %v70_v24 }
 0x12e   :  { %2260 = vrsqrt.f32 %v72_v25 }
 0x134   :  { %v2259_v26 = vpop.eup %2258 }
 0x135   :  { %v75_v28 = vmul.f32 %v2259_v26, %v59_v6 }
 0x137   :  { %v83_v30 = vmul.f32 %v1929_v27, %v75_v28 }
 0x138   :  { %v2261_v31 = vpop.eup %2260 }
 0x139   :  { %v76_v32 = vmul.f32 %v2261_v31, %v60_v10  ;;  %v91_v33 = vadd.f32 %v1930_v29, %v83_v30 }
 0x13b   :  { %v84_v34 = vmul.f32 %v1929_v27, %v76_v32  ;;  %2043 = vmatprep.mubr.msk.f32.mxu1 %vm49_vm0, %v91_v33 }
 0x13d   :  { %v92_v35 = vadd.f32 %v1930_v29, %v84_v34 }
 0x13f   :  { %2044 = vmatmul.mubr.msk.f32.vlgmr.msra.gmra.mrb[0].mxu1 %vm49_vm0, %v92_v35 }
 0x140   :  { %2048 = vmatprep.mubr.msk.f32.mxu1 %vm2327_vm1, %v2326_v36 }
 0x212   :  { %v2045_v38 = vpop.f32.mrb[0].mxu1 }
 0x213   :  { %v176_v39 = vpop.f32.mrb[1].mxu1  ;;  %v2470_v41 = vadd.f32 %v2045_v38, %v1931_v37 }
 0x214   :  { %v2462_v40 = vadd.f32 %v1931_v37, %v176_v39 }
 0x216   :  { %361 = vrot.lane.b32.xlu1 %v2462_v40, %s2328_s22  ;;  %192 = vrot.lane.b32.xlu0 %v2462_v40, %s2329_s23 }
 0x21a   :  { %359 = vrot.lane.b32.xlu1 %v2462_v40, %s2330_s24  ;;  %532 = vrot.lane.b32.xlu0 %v2462_v40, %s2331_s25 }
 0x21e   :  { %534 = vrot.lane.b32.xlu1 %v2462_v40, %s2332_s26  ;;  %705 = vrot.lane.b32.xlu0 %v2462_v40, %s2333_s4 }
 0x222   :  { %707 = vrot.lane.b32.xlu1 %v2462_v40, %s2334_s27  ;;  %1047 = vrot.lane.b32.xlu0 %v2470_v41, %s2328_s22 }
 0x226   :  { %879 = vrot.lane.b32.xlu1 %v2470_v41, %s2329_s23  ;;  %1219 = vrot.lane.b32.xlu0 %v2470_v41, %s2332_s26 }
 0x22a   :  { %1045 = vrot.lane.b32.xlu1 %v2470_v41, %s2330_s24  ;;  %1391 = vrot.lane.b32.xlu0 %v2470_v41, %s2334_s27 }
 0x22e   :  { %1217 = vrot.lane.b32.xlu1 %v2470_v41, %s2331_s25 }
 0x232   :  { %1389 = vrot.lane.b32.xlu1 %v2470_v41, %s2333_s4 }
 0x288   :  { %v362_v42 = vpop.permute.xlu1 %361  ;;  %v193_v43 = vpop.permute.xlu0 %192 }
 0x289   :  { %2047 = vmatpush3.xpose.msk.msra.mxu1 %vm194_vm2, %v193_v43  ;;  %2057 = vmatpush3.xpose.msk.msra.mxu0 %vm194_vm2, %v362_v42 }
 0x28a   :  { %2066 = vmatprep.subr.mxu0 %v2326_v36  ;;  %2051 = vmatprep.subr.mxu1 %v2326_v36 }
 0x28c   :  { %v360_v44 = vpop.permute.xlu1 %359  ;;  %2049 = vmatmul.mubr.msk.f32.vlgmr.msra.gmra.mrb[2].mxu1 %vm194_vm2, %v2462_v40  ;;  %v533_v45 = vpop.permute.xlu0 %532 }
 0x28d   :  { %2059 = vmatmul.mubr.msk.f32.vlgmr.msra.gmra.mrb[0].mxu0 %vm194_vm2, %v360_v44  ;;  %2053 = vmatprep.mubr.msk.f32.mxu1 %vm2327_vm1, %v2326_v36 }
 0x28e   :  { %2068 = vmatprep.mubr.msk.f32.mxu0 %vm2327_vm1, %v2326_v36 }
 0x290   :  { %v535_v46 = vpop.permute.xlu1 %534  ;;  %v706_v47 = vpop.permute.xlu0 %705 }
 0x291   :  { %2067 = vmatpush3.xpose.msk.msra.mxu0 %vm194_vm2, %v535_v46 }
 0x292   :  { %2076 = vmatprep.subr.mxu0 %v2326_v36 }
 0x294   :  { %v708_v48 = vpop.permute.xlu1 %707  ;;  %2069 = vmatmul.mubr.msk.f32.vlgmr.msra.gmra.mrb[2].mxu0 %vm194_vm2, %v533_v45  ;;  %v1048_v49 = vpop.permute.xlu0 %1047 }
 0x295   :  { %2077 = vmatpush3.xpose.msk.msra.mxu0 %vm194_vm2, %v708_v48  ;;  %2078 = vmatprep.mubr.msk.f32.mxu0 %vm2327_vm1, %v2326_v36 }
 0x296   :  { %2086 = vmatprep.subr.mxu0 %v2326_v36 }
 0x298   :  { %v880_v50 = vpop.permute.xlu1 %879  ;;  %2079 = vmatmul.mubr.msk.f32.vlgmr.msra.gmra.mrb[4].mxu0 %vm194_vm2, %v706_v47  ;;  %v1220_v52 = vpop.permute.xlu0 %1219 }
 0x299   :  { %2087 = vmatpush3.xpose.msk.msra.mxu0 %vm194_vm2, %v880_v50  ;;  %2088 = vmatprep.mubr.msk.f32.mxu0 %vm2327_vm1, %v2326_v36 }
 0x29a   :  { %2096 = vmatprep.subr.mxu0 %v2326_v36 }
 0x29c   :  { %v1046_v51 = vpop.permute.xlu1 %1045  ;;  %2089 = vmatmul.mubr.msk.f32.vlgmr.msra.gmra.mrb[6].mxu0 %vm194_vm2, %v2470_v41  ;;  %v1392_v54 = vpop.permute.xlu0 %1391 }
 0x29d   :  { %2097 = vmatpush3.xpose.msk.msra.mxu0 %vm194_vm2, %v1048_v49  ;;  %2098 = vmatprep.mubr.msk.f32.mxu0 %vm2327_vm1, %v2326_v36 }
 0x29e   :  { %2106 = vmatprep.subr.mxu0 %v2326_v36 }
 0x2a0   :  { %2099 = vmatmul.mubr.msk.f32.vlgmr.msra.gmra.mrb[8].mxu0 %vm194_vm2, %v1046_v51  ;;  %v1218_v53 = vpop.permute.xlu1 %1217 }
 0x2a1   :  { %2107 = vmatpush3.xpose.msk.msra.mxu0 %vm194_vm2, %v1220_v52  ;;  %2108 = vmatprep.mubr.msk.f32.mxu0 %vm2327_vm1, %v2326_v36 }
 0x2a2   :  { %2116 = vmatprep.subr.mxu0 %v2326_v36 }
 0x2a4   :  { %2109 = vmatmul.mubr.msk.f32.vlgmr.msra.gmra.mrb[10].mxu0 %vm194_vm2, %v1218_v53  ;;  %v1390_v55 = vpop.permute.xlu1 %1389 }
 0x2a5   :  { %2117 = vmatpush3.xpose.msk.msra.mxu0 %vm194_vm2, %v1392_v54  ;;  %2118 = vmatprep.mubr.msk.f32.mxu0 %vm2327_vm1, %v2326_v36 }
 0x2a8   :  { %2119 = vmatmul.mubr.msk.f32.vlgmr.msra.gmra.mrb[12].mxu0 %vm194_vm2, %v1390_v55 }
 0x35f   :  { %v265_v59 = vpop.f32.mrb[2].mxu1 }
 0x360   :  { %v269_v62 = vmul.f32 2.828427, %v265_v59  ;;  %v2050_v63 = vpop.f32.mrb[3].mxu1  ;;  %v433_v2 = vpop.f32.mrb[0].mxu0 }
 0x361   :  { %v437_v3 = vmul.f32 2.828427, %v433_v2  ;;  %v2060_v4 = vpop.f32.mrb[1].mxu0 }
 0x362   :  { %v270_v5 = vadd.f32 %v269_v62, %v190_v61 }
 0x363   :  { %v438_v6 = vadd.f32 %v437_v3, %v190_v61 }
 0x364   :  { %v271_v7 = vsel %vm194_vm2, %v270_v5, -inf }
 0x365   :  { %272 = vmax.xlane.f32.xlu0 %v271_v7  ;;  %v439_v8 = vsel %vm194_vm2, %v438_v6, -inf }
 0x366   :  { %440 = vmax.xlane.f32.xlu1 %v439_v8 }
 0x367   :  { %v606_v9 = vpop.f32.mrb[2].mxu0 }
 0x368   :  { %v610_v10 = vmul.f32 2.828427, %v606_v9  ;;  %v2070_v11 = vpop.f32.mrb[3].mxu0 }
 0x36a   :  { %v2521_v12 = vadd.f32 %v610_v10, %v190_v61 }
 0x36b   :  { %v779_v13 = vpop.f32.mrb[4].mxu0 }
 0x36c   :  { %v783_v14 = vmul.f32 2.828427, %v779_v13  ;;  %v2080_v15 = vpop.f32.mrb[5].mxu0  ;;  %v612_v16 = vsel %vm194_vm2, %v2521_v12, -inf }
 0x36d   :  { %613 = vmax.xlane.f32.xlu0 %v612_v16 }
 0x36e   :  { %v784_v17 = vadd.f32 %v783_v14, %v190_v61 }
 0x36f   :  { %v951_v18 = vpop.f32.mrb[6].mxu0 }
 0x370   :  { %v955_v19 = vmul.f32 2.828427, %v951_v18  ;;  %v2090_v20 = vpop.f32.mrb[7].mxu0  ;;  %v785_v21 = vsel %vm194_vm2, %v784_v17, -inf }
 0x371   :  { %786 = vmax.xlane.f32.xlu0 %v785_v21 }
 0x372   :  { %v2526_v22 = vadd.f32 %v955_v19, %v190_v61 }
 0x373   :  { %v1119_v23 = vpop.f32.mrb[8].mxu0 }
 0x374   :  { %v1123_v24 = vmul.f32 2.828427, %v1119_v23  ;;  %v2100_v25 = vpop.f32.mrb[9].mxu0  ;;  %v957_v26 = vsel %vm194_vm2, %v2526_v22, -inf }
 0x375   :  { %958 = vmax.xlane.f32.xlu0 %v957_v26 }
 0x376   :  { %v1124_v27 = vadd.f32 %v1123_v24, %v190_v61 }
 0x377   :  { %v1291_v28 = vpop.f32.mrb[10].mxu0 }
 0x378   :  { %v1295_v29 = vmul.f32 2.828427, %v1291_v28  ;;  %v2110_v30 = vpop.f32.mrb[11].mxu0  ;;  %v1125_v31 = vsel %vm194_vm2, %v1124_v27, -inf }
 0x379   :  { %1126 = vmax.xlane.f32.xlu1 %v1125_v31 }
 0x37a   :  { %v1296_v32 = vadd.f32 %v1295_v29, %v190_v61 }
 0x37b   :  { %v1463_v33 = vpop.f32.mrb[12].mxu0 }
 0x37c   :  { %v1467_v34 = vmul.f32 2.828427, %v1463_v33  ;;  %v2120_v35 = vpop.f32.mrb[13].mxu0  ;;  %v1297_v37 = vsel %vm194_vm2, %v1296_v32, -inf }
 0x37d   :  { %1298 = vmax.xlane.f32.xlu0 %v1297_v37 }
 0x37e   :  { %v1468_v38 = vadd.f32 %v1467_v34, %v190_v61 }
 0x380   :  { %v1469_v39 = vsel %vm194_vm2, %v1468_v38, -inf }
 0x38a   :  { %282 = vrot.lane.b32.xlu1 %v2462_v40, %s2336_s28 }
 0x3ae   :  { %1470 = vmax.xlane.f32.xlu1 %v1469_v39 }
 0x3bf   :  { %623 = vrot.lane.b32.xlu1 %v2462_v40, %s2337_s0 }
 0x3c3   :  { %796 = vrot.lane.b32.xlu1 %v2462_v40, %s2338_s29 }
 0x3c7   :  { %968 = vrot.lane.b32.xlu1 %v2470_v41, %s2336_s28 }
 0x3f2   :  { %v273_v42 = vpop.xlane.xlu0 %272 }
 0x3f3   :  { %v274_v43 = vsub.f32 %v270_v5, %v273_v42  ;;  %v441_v44 = vpop.xlane.xlu1 %440 }
 0x3f4   :  { %v442_v45 = vsub.f32 %v438_v6, %v441_v44 }
 0x3f5   :  { %v275_v46 = vmul.f32 1.442695, %v274_v43 }
 0x3f6   :  { %v443_v47 = vmul.f32 1.442695, %v442_v45 }
 0x3f7   :  { %2262 = vpow2.f32 %v275_v46 }
 0x3f8   :  { %2264 = vpow2.f32 %v443_v47 }
 0x3fa   :  { %v614_v48 = vpop.xlane.xlu0 %613 }
 0x3fb   :  { %v615_v60 = vsub.f32 %v2521_v12, %v614_v48 }
 0x3fd   :  { %v616_v62 = vmul.f32 1.442695, %v615_v60  ;;  %v1563_v60 = vld [vmem:[%s2731_s5] sm:$0xff] }
 0x3fe   :  { %v787_v49 = vpop.xlane.xlu0 %786 }
 0x3ff   :  { %v788_v50 = vsub.f32 %v784_v17, %v787_v49 }
 0x401   :  { %v2263_v51 = vpop.eup %2262  ;;  %v789_v52 = vmul.f32 1.442695, %v788_v50 }
 0x402   :  { %v2539_v53 = vpop.eup %2264  ;;  %v277_v54 = vsel %vm194_vm2, %v2263_v51, 0.0  ;;  %v959_v61 = vpop.xlane.xlu0 %958 }
 0x403   :  { %2266 = vpow2.f32 %v789_v52  ;;  %278 = vadd.xlane.f32.xlu0 %v277_v54  ;;  %v445_v55 = vsel %vm194_vm2, %v2539_v53, 0.0  ;;  %v960_v63 = vsub.f32 %v2526_v22, %v959_v61  ;;  %v1564_v61 = vld [vmem:[%s2731_s5 + $0x8] sm:$0xff] }
 0x404   :  { %446 = vadd.xlane.f32.xlu1 %v445_v55  ;;  %2268 = vpow2.f32 %v616_v62  ;;  %v2191_v62 = vpack.c.bf16 %v1564_v61, %v1563_v60 }
 0x405   :  { %v961_v3 = vmul.f32 1.442695, %v960_v63 }
 0x406   :  { %v1127_v56 = vpop.xlane.xlu1 %1126 }
 0x407   :  { %2270 = vpow2.f32 %v961_v3  ;;  %v1128_v5 = vsub.f32 %v1124_v27, %v1127_v56  ;;  %v1566_v3 = vld [vmem:[%s2731_s5 + $0x18] sm:$0xff] }
 0x409   :  { %v1129_v7 = vmul.f32 1.442695, %v1128_v5 }
 0x40a   :  { %v283_v57 = vpop.permute.xlu1 %282  ;;  %v1299_v2 = vpop.xlane.xlu0 %1298 }
 0x40b   :  { %2052 = vmatpush3.msra.mxu1 %v283_v57  ;;  %v1300_v4 = vsub.f32 %v1296_v32, %v1299_v2  ;;  %v1565_v2 = vld [vmem:[%s2731_s5 + $0x10] sm:$0xff] }
 0x40c   :  { %2061 = vmatprep.subr.mxu1 %v2326_v36  ;;  %v2195_v5 = vpack.c.bf16 %v1566_v3, %v1565_v2  ;;  %v1815_v3 = vld [vmem:[%s2737_s11 + $0x20] sm:$0xff] }
 0x40d   :  { %v2545_v58 = vpop.eup %2266  ;;  %v1301_v6 = vmul.f32 1.442695, %v1300_v4 }
 0x40e   :  { %v791_v59 = vsel %vm194_vm2, %v2545_v58, 0.0  ;;  %v2269_v8 = vpop.eup %2268 }
 0x40f   :  { %792 = vadd.xlane.f32.xlu1 %v791_v59  ;;  %2272 = vpow2.f32 %v1301_v6 }
 0x410   :  { %2274 = vpow2.f32 %v1129_v7 }
 0x411   :  { %v2271_v9 = vpop.eup %2270 }
 0x412   :  { %v963_v11 = vsel %vm194_vm2, %v2271_v9, 0.0 }
 0x419   :  { %450 = vrot.lane.b32.xlu0 %v2462_v40, %s2339_s30  ;;  %v618_v40 = vsel %vm194_vm2, %v2269_v8, 0.0  ;;  %v2555_v12 = vpop.eup %2272 }
 0x41a   :  { %v1303_v15 = vsel %vm194_vm2, %v2555_v12, 0.0  ;;  %v2275_v16 = vpop.eup %2274 }
 0x41b   :  { %v1131_v17 = vsel %vm194_vm2, %v2275_v16, 0.0 }
 0x420   :  { %1136 = vrot.lane.b32.xlu1 %v2470_v41, %s2339_s30 }
 0x438   :  { %619 = vadd.xlane.f32.xlu0 %v618_v40 }
 0x43b   :  { %v1471_v10 = vpop.xlane.xlu1 %1470 }
 0x43c   :  { %v1472_v13 = vsub.f32 %v1468_v38, %v1471_v10  ;;  %964 = vadd.xlane.f32.xlu0 %v963_v11 }
 0x43e   :  { %v1473_v14 = vmul.f32 1.442695, %v1472_v13 }
 0x43f   :  { %v624_v20 = vpop.permute.xlu1 %623 }
 0x440   :  { %2276 = vpow2.f32 %v1473_v14  ;;  %1304 = vadd.xlane.f32.xlu0 %v1303_v15 }
 0x443   :  { %v797_v21 = vpop.permute.xlu1 %796 }
 0x444   :  { %1132 = vadd.xlane.f32.xlu1 %v1131_v17 }
 0x447   :  { %v969_v22 = vpop.permute.xlu1 %968 }
 0x44a   :  { %v2560_v18 = vpop.eup %2276 }
 0x44b   :  { %v1475_v19 = vsel %vm194_vm2, %v2560_v18, 0.0 }
 0x44c   :  { %1476 = vadd.xlane.f32.xlu0 %v1475_v19  ;;  %v1958_v19 = vld [vmem:[%s2732_s6] ss:$0 sm:$0xff] }
 0x455   :  { %1480 = vrot.lane.b32.xlu1 %v2470_v41, %s2338_s29 }
 0x462   :  { %1308 = vrot.lane.b32.xlu0 %v2470_v41, %s2337_s0 }
 0x490   :  { %v279_v23 = vpop.xlane.xlu0 %278 }
 0x491   :  { %2278 = vrcp.f32 %v279_v23  ;;  %v447_v24 = vpop.xlane.xlu1 %446 }
 0x492   :  { %2280 = vrcp.f32 %v447_v24 }
 0x494   :  { %v451_v28 = vpop.permute.xlu0 %450 }
 0x49b   :  { %v2279_v25 = vpop.eup %2278 }
 0x49c   :  { %v281_v26 = vmul.f32 %v2279_v25, %v2263_v51  ;;  %v2281_v27 = vpop.eup %2280  ;;  %v793_v41 = vpop.xlane.xlu1 %792 }
 0x49d   :  { %v449_v29 = vmul.f32 %v2281_v27, %v2539_v53 }
 0x49e   :  { %2054 = vmatmul.mubr.msk.f32.vlgmr.msra.gmra.mrb[4].mxu1 %vm194_vm2, %v281_v26 }
 0x49f   :  { %2062 = vmatpush3.msra.mxu1 %v451_v28  ;;  %2063 = vmatprep.mubr.msk.f32.mxu1 %vm2327_vm1, %v2326_v36 }
 0x4a0   :  { %2071 = vmatprep.subr.mxu1 %v2326_v36  ;;  %v1137_v32 = vpop.permute.xlu1 %1136 }
 0x4a2   :  { %2064 = vmatmul.mubr.msk.f32.vlgmr.msra.gmra.mrb[6].mxu1 %vm194_vm2, %v449_v29 }
 0x4a3   :  { %2072 = vmatpush3.msra.mxu1 %v624_v20  ;;  %2073 = vmatprep.mubr.msk.f32.mxu1 %vm2327_vm1, %v2326_v36 }
 0x4a4   :  { %2081 = vmatprep.subr.mxu1 %v2326_v36 }
 0x4c5   :  { %v620_v30 = vpop.xlane.xlu0 %619 }
 0x4c6   :  { %2282 = vrcp.f32 %v620_v30 }
 0x4c7   :  { %2284 = vrcp.f32 %v793_v41 }
 0x4c9   :  { %v965_v31 = vpop.xlane.xlu0 %964 }
 0x4ca   :  { %2286 = vrcp.f32 %v965_v31 }
 0x4cd   :  { %v1305_v35 = vpop.xlane.xlu0 %1304 }
 0x4d0   :  { %v2283_v33 = vpop.eup %2282 }
 0x4d1   :  { %v622_v34 = vmul.f32 %v2283_v33, %v2269_v8  ;;  %v1133_v37 = vpop.xlane.xlu1 %1132  ;;  %v2285_v38 = vpop.eup %2284 }
 0x4d2   :  { %2288 = vrcp.f32 %v1133_v37  ;;  %v795_v39 = vmul.f32 %v2285_v38, %v2545_v58  ;;  %v1702_v37 = vld [vmem:[%s2735_s9 + $0x8] sm:$0xff] }
 0x4d3   :  { %2074 = vmatmul.mubr.msk.f32.vlgmr.msra.gmra.mrb[8].mxu1 %vm194_vm2, %v622_v34  ;;  %2290 = vrcp.f32 %v1305_v35  ;;  %v1701_v35 = vld [vmem:[%s2735_s9] sm:$0xff] }
 0x4d4   :  { %2082 = vmatpush3.msra.mxu1 %v797_v21  ;;  %2083 = vmatprep.mubr.msk.f32.mxu1 %vm2327_vm1, %v2326_v36  ;;  %v2287_v42 = vpop.eup %2286  ;;  %v2199_v38 = vpack.c.bf16 %v1702_v37, %v1701_v35 }
 0x4d5   :  { %2091 = vmatprep.subr.mxu1 %v2326_v36  ;;  %v967_v43 = vmul.f32 %v2287_v42, %v2271_v9  ;;  %v1481_v50 = vpop.permute.xlu1 %1480  ;;  %v1704_v42 = vld [vmem:[%s2735_s9 + $0x18] sm:$0xff] }
 0x4d7   :  { %2084 = vmatmul.mubr.msk.f32.vlgmr.msra.gmra.mrb[10].mxu1 %vm194_vm2, %v795_v39  ;;  %v1703_v39 = vld [vmem:[%s2735_s9 + $0x10] sm:$0xff] }
 0x4d8   :  { %2092 = vmatpush3.msra.mxu1 %v969_v22  ;;  %2093 = vmatprep.mubr.msk.f32.mxu1 %vm2327_vm1, %v2326_v36 }
 0x4d9   :  { %v1477_v44 = vpop.xlane.xlu0 %1476  ;;  %2101 = vmatprep.subr.mxu1 %v2326_v36 }
 0x4da   :  { %2292 = vrcp.f32 %v1477_v44  ;;  %v1811_v44 = vld [vmem:[%s2737_s11] sm:$0xff] }
 0x4db   :  { %2094 = vmatmul.mubr.msk.f32.vlgmr.msra.gmra.mrb[12].mxu1 %vm194_vm2, %v967_v43  ;;  %v2203_v43 = vpack.c.bf16 %v1704_v42, %v1703_v39 }
 0x4dc   :  { %v2289_v45 = vpop.eup %2288  ;;  %2102 = vmatpush3.msra.mxu1 %v1137_v32  ;;  %2103 = vmatprep.mubr.msk.f32.mxu1 %vm2327_vm1, %v2326_v36 }
 0x4dd   :  { %v1135_v46 = vmul.f32 %v2289_v45, %v2275_v16  ;;  %v1309_v47 = vpop.permute.xlu0 %1308  ;;  %2111 = vmatprep.subr.mxu1 %v2326_v36  ;;  %v2291_v48 = vpop.eup %2290  ;;  %v1812_v45 = vld [vmem:[%s2737_s11 + $0x8] sm:$0xff] }
 0x4de   :  { %v1307_v49 = vmul.f32 %v2291_v48, %v2555_v12 }
 0x4df   :  { %2104 = vmatmul.mubr.msk.f32.vlgmr.msra.gmra.mrb[14].mxu1 %vm194_vm2, %v1135_v46  ;;  %v2207_v46 = vpack.c.bf16 %v1812_v45, %v1811_v44  ;;  %v1966_v45 = vld [vmem:[%s2738_s12] ss:$0 sm:$0xff] }
 0x4e0   :  { %2112 = vmatpush3.msra.mxu1 %v1309_v47  ;;  %2113 = vmatprep.mubr.msk.f32.mxu1 %vm2327_vm1, %v2326_v36 }
 0x4e1   :  { %2121 = vmatprep.subr.mxu1 %v2326_v36  ;;  %2208 = vmatprep.subr.bf16.mxu0 %v2207_v46 }
 0x4e2   :  { %2210 = vmatpush3.bf16.msra.mxu0 %v2207_v46 }
 0x4e3   :  { %2114 = vmatmul.mubr.msk.f32.vlgmr.msra.gmra.mrb[16].mxu1 %vm194_vm2, %v1307_v49 }
 0x4e4   :  { %v2293_v51 = vpop.eup %2292  ;;  %2122 = vmatpush3.msra.mxu1 %v1481_v50  ;;  %2123 = vmatprep.mubr.msk.f32.mxu1 %vm2327_vm1, %v2326_v36 }
 0x4e5   :  { %v1479_v52 = vmul.f32 %v2293_v51, %v2560_v18  ;;  %2192 = vmatprep.subr.bf16.mxu1 %v2191_v62 }
 0x4e7   :  { %2124 = vmatmul.mubr.msk.f32.vlgmr.msra.gmra.mrb[18].mxu1 %vm194_vm2, %v1479_v52 }
 0x4e8   :  { %2194 = vmatpush3.bf16.msra.mxu1 %v2191_v62  ;;  %v1813_v62 = vld [vmem:[%s2737_s11 + $0x10] sm:$0xff] }
 0x4e9   :  { %2196 = vmatprep.subr.bf16.mxu1 %v2195_v5 }
 0x4ec   :  { %2198 = vmatpush3.bf16.msra.mxu1 %v2195_v5 }
 0x4ed   :  { %2200 = vmatprep.subr.bf16.mxu1 %v2199_v38 }
 0x571   :  { %v354_v53 = vpop.f32.mrb[4].mxu1 }
 0x572   :  { %358 = vst.msk [vmem:[#allocation2] sm:$0xff] %vm194_vm2, %v354_v53  ;;  %v2055_v54 = vpop.f32.mrb[5].mxu1 }
 0x573   :  { %v1961_v54 = vld [vmem:[%s2733_s7] ss:$0 sm:$0xff] }
 0x575   :  { %v522_v55 = vpop.f32.mrb[6].mxu1 }
 0x576   :  { %527 = vrot.lane.b32.xlu0 %v522_v55, %s2340_s14  ;;  %v2065_v56 = vpop.f32.mrb[7].mxu1 }
 0x577   :  { %v1962_v56 = vld [vmem:[%s2734_s8] ss:$0 sm:$0xff]  ;;  %s2343_s8 = smov [#allocation3]  }
 0x578   :  { %s1918_s21 = sshll.u32 %s2343_s8, 4  ;;  %s1919_s21 = int_to_ptr.vmem [resolvable:$true] %s1918_s21 }
 0x579   :  { %s2302_s1 = scalar_lea.vmem %s1919_s21, 256  ;;  %p2307_p1 = scmp.lt.s32.totalorder %s1919_s21, %s1919_s21 }
 0x57a   :  { %p2303_p0 = scmp.ne.s32.totalorder %s1919_s21, %s2302_s1  ;;  %p2308_p2 = scmp.lt.s32.totalorder %s2302_s1, %s2302_s1 }
 0x57c   :  { %p2309_p3 = por %p2308_p2, %p2307_p1 }
 0x57e   :  { %p2310_p4 = pnand %p2309_p3, %p2303_p0 }
 0x5a6   :  { %v695_v57 = vpop.f32.mrb[8].mxu1 }
 0x5a7   :  { %700 = vrot.lane.b32.xlu1 %v695_v57, %s2341_s15  ;;  %v2075_v58 = vpop.f32.mrb[9].mxu1 }
 0x5aa   :  { %v868_v59 = vpop.f32.mrb[10].mxu1 }
 0x5ab   :  { %873 = vrot.lane.b32.xlu1 %v868_v59, %s2342_s16  ;;  %v2085_v36 = vpop.f32.mrb[11].mxu1 }
 0x5ae   :  { %v1040_v63 = vpop.f32.mrb[12].mxu1 }
 0x5af   :  { %1044 = vst.msk [vmem:[#allocation2 + $0x8] sm:$0xff] %vm194_vm2, %v1040_v63  ;;  %v2095_v4 = vpop.f32.mrb[13].mxu1  ;;  %v1814_v63 = vld [vmem:[%s2737_s11 + $0x18] sm:$0xff] }
 0x5b0   :  { %v2211_v2 = vpack.c.bf16 %v1814_v63, %v1813_v62  ;;  %v1816_v4 = vld [vmem:[%s2737_s11 + $0x28] sm:$0xff] }
 0x5b1   :  { %v2215_v5 = vpack.c.bf16 %v1816_v4, %v1815_v3 }
 0x5b2   :  { %v1208_v6 = vpop.f32.mrb[14].mxu1  ;;  %2212 = vmatprep.subr.bf16.mxu0 %v2211_v2 }
 0x5b3   :  { %1213 = vrot.lane.b32.xlu0 %v1208_v6, %s2340_s14  ;;  %v2105_v7 = vpop.f32.mrb[15].mxu1  ;;  %2214 = vmatpush3.bf16.msra.mxu0 %v2211_v2  ;;  %v1817_v6 = vld [vmem:[%s2737_s11 + $0x30] sm:$0xff] }
 0x5b4   :  { %2216 = vmatprep.subr.bf16.mxu0 %v2215_v5  ;;  %v1818_v7 = vld [vmem:[%s2737_s11 + $0x38] sm:$0xff] }
 0x5b6   :  { %v1380_v8 = vpop.f32.mrb[16].mxu1 }
 0x5b7   :  { %1385 = vrot.lane.b32.xlu0 %v1380_v8, %s2341_s15  ;;  %v2115_v40 = vpop.f32.mrb[17].mxu1  ;;  %2218 = vmatpush3.bf16.msra.mxu0 %v2215_v5  ;;  %v2219_v8 = vpack.c.bf16 %v1818_v7, %v1817_v6 }
 0x5b8   :  { %v1819_v40 = vld [vmem:[%s2737_s11 + $0x40] sm:$0xff] }
 0x5b9   :  { %2220 = vmatprep.subr.bf16.mxu0 %v2219_v8 }
 0x5ba   :  { %v1552_v9 = vpop.f32.mrb[18].mxu1 }
 0x5bb   :  { %1557 = vrot.lane.b32.xlu1 %v1552_v9, %s2342_s16  ;;  %v2125_v10 = vpop.f32.mrb[19].mxu1  ;;  %v1820_v9 = vld [vmem:[%s2737_s11 + $0x48] sm:$0xff]  ;;  %2222 = vmatpush3.bf16.msra.mxu0 %v2219_v8 }
 0x5bc   :  { %v2223_v10 = vpack.c.bf16 %v1820_v9, %v1819_v40 }
 0x5be   :  { %2224 = vmatprep.subr.bf16.mxu0 %v2223_v10 }
 0x5bf   :  { %2226 = vmatpush3.bf16.msra.mxu0 %v2223_v10 }
 0x5e8   :  { %v528_v11 = vpop.permute.xlu0 %527 }
 0x5e9   :  { %531 = vst.msk [vmem:[#allocation2] sm:$0xff] %vm530_vm4, %v528_v11  ;;  %v1821_v11 = vld [vmem:[%s2737_s11 + $0x50] sm:$0xff] }
 0x619   :  { %v701_v12 = vpop.permute.xlu1 %700 }
 0x61a   :  { %704 = vst.msk [vmem:[#allocation2] sm:$0xff] %vm703_vm5, %v701_v12  ;;  %v1822_v12 = vld [vmem:[%s2737_s11 + $0x58] sm:$0xff] }
 0x61d   :  { %v874_v13 = vpop.permute.xlu1 %873 }
 0x61e   :  { %877 = vst.msk [vmem:[#allocation2] sm:$0xff] %vm876_vm6, %v874_v13  ;;  %v2227_v13 = vpack.c.bf16 %v1822_v12, %v1821_v11 }
 0x620   :  { %2228 = vmatprep.subr.bf16.mxu0 %v2227_v13 }
 0x621   :  { %2230 = vmatpush3.bf16.msra.mxu0 %v2227_v13 }
 0x625   :  { %v1214_v14 = vpop.permute.xlu0 %1213  ;;  %v1561_v15 = vld [vmem:[#allocation2] sm:$0xff] }
 0x626   :  { %1216 = vst.msk [vmem:[#allocation2 + $0x8] sm:$0xff] %vm530_vm4, %v1214_v14  ;;  %2134 = vmatprep.mubr.msk.f32.mxu1 %vm49_vm0, %v1561_v15  ;;  %v1823_v14 = vld [vmem:[%s2737_s11 + $0x60] sm:$0xff]  ;;  %v1824_v15 = vld [vmem:[%s2737_s11 + $0x68] sm:$0xff] }
 0x629   :  { %v1386_v16 = vpop.permute.xlu0 %1385 }
 0x62a   :  { %1388 = vst.msk [vmem:[#allocation2 + $0x8] sm:$0xff] %vm703_vm5, %v1386_v16  ;;  %v2231_v16 = vpack.c.bf16 %v1824_v15, %v1823_v14 }
 0x62c   :  { %2232 = vmatprep.subr.bf16.mxu0 %v2231_v16 }
 0x62d   :  { %v1558_v17 = vpop.permute.xlu1 %1557  ;;  %2234 = vmatpush3.bf16.msra.mxu0 %v2231_v16 }
 0x62e   :  { %1560 = vst.msk [vmem:[#allocation2 + $0x8] sm:$0xff] %vm876_vm6, %v1558_v17  ;;  %v1825_v17 = vld [vmem:[%s2737_s11 + $0x70] sm:$0xff] }
 0x635   :  { %v1562_v18 = vld [vmem:[#allocation2 + $0x8] sm:$0xff] }
 0x636   :  { %2135 = vmatmul.mubr.msk.f32.vlgmr.msra.gmra.mrb[20].mxu1 %vm49_vm0, %v1562_v18  ;;  %v1826_v18 = vld [vmem:[%s2737_s11 + $0x78] sm:$0xff] }
 0x637   :  { %2202 = vmatpush3.bf16.msra.mxu1 %v2199_v38 }
 0x638   :  { %2204 = vmatprep.subr.bf16.mxu1 %v2203_v43 }
 0x63b   :  { %2206 = vmatpush3.bf16.msra.mxu1 %v2203_v43 }
 0x709   :  { %v2136_v20 = vpop.f32.mrb[20].mxu1 }
 0x70a   :  { %v1652_v21 = vadd.f32 %v2136_v20, %v1958_v19  ;;  %v1646_v22 = vpop.f32.mrb[21].mxu1  ;;  %v1963_v20 = vld [vmem:[%s2736_s10] ss:$0 sm:$0xff] }
 0x70b   :  { %v1647_v23 = vadd.f32 %v1958_v19, %v1646_v22  ;;  %v2235_v19 = vpack.c.bf16 %v1826_v18, %v1825_v17 }
 0x70c   :  { %v2622_v24 = vadd.f32 %v1652_v21, %v2423_v1 }
 0x70d   :  { %v2625_v25 = vadd.f32 %v1647_v23, %v2418_v0  ;;  %2236 = vmatprep.subr.bf16.mxu0 %v2235_v19 }
 0x70e   :  { %v1662_v26 = vsel %vm49_vm0, %v2622_v24, 0.0  ;;  %2238 = vmatpush3.bf16.msra.mxu0 %v2235_v19 }
 0x70f   :  { %1663 = vadd.xlane.f32.xlu1 %v1662_v26  ;;  %v1659_v27 = vsel %vm49_vm0, %v2625_v25, 0.0 }
 0x710   :  { %1660 = vadd.xlane.f32.xlu0 %v1659_v27 }
 0x79c   :  { %v1664_v28 = vpop.xlane.xlu1 %1663 }
 0x79d   :  { %v1666_v29 = vmul.f32 0.03125, %v1664_v28  ;;  %v1661_v41 = vpop.xlane.xlu0 %1660 }
 0x79e   :  { %v1665_v30 = vmul.f32 0.03125, %v1661_v41 }
 0x79f   :  { %v1668_v31 = vsub.f32 %v2622_v24, %v1666_v29 }
 0x7a0   :  { %v1667_v1 = vsub.f32 %v2625_v25, %v1665_v30 }
 0x7a1   :  { %v1670_v33 = vmul.f32 %v1668_v31, %v1668_v31 }
 0x7a2   :  { %v1669_v32 = vmul.f32 %v1667_v1, %v1667_v1 }
 0x7a3   :  { %v1674_v34 = vsel %vm49_vm0, %v1670_v33, 0.0 }
 0x7a4   :  { %v1671_v0 = vsel %vm49_vm0, %v1669_v32, 0.0 }
 0x7a5   :  { %1672 = vadd.xlane.f32.xlu0 %v1671_v0 }
 0x7a9   :  { %1675 = vadd.xlane.f32.xlu0 %v1674_v34 }
 0x832   :  { %v1673_v47 = vpop.xlane.xlu0 %1672 }
 0x833   :  { %v1677_v48 = vmul.f32 0.03125, %v1673_v47 }
 0x835   :  { %v1679_v49 = vadd.f32 1e-05, %v1677_v48 }
 0x836   :  { %v1676_v50 = vpop.xlane.xlu0 %1675 }
 0x837   :  { %2294 = vrsqrt.f32 %v1679_v49  ;;  %v1678_v51 = vmul.f32 0.03125, %v1676_v50 }
 0x839   :  { %v1680_v52 = vadd.f32 1e-05, %v1678_v51 }
 0x83b   :  { %2296 = vrsqrt.f32 %v1680_v52 }
 0x841   :  { %v2295_v53 = vpop.eup %2294 }
 0x842   :  { %v1683_v55 = vmul.f32 %v2295_v53, %v1667_v1 }
 0x844   :  { %v1691_v57 = vmul.f32 %v1961_v54, %v1683_v55 }
 0x845   :  { %v2297_v58 = vpop.eup %2296 }
 0x846   :  { %v1684_v59 = vmul.f32 %v2297_v58, %v1668_v31  ;;  %v1699_v36 = vadd.f32 %v1962_v56, %v1691_v57 }
 0x848   :  { %v1692_v60 = vmul.f32 %v1961_v54, %v1684_v59  ;;  %2145 = vmatprep.mubr.msk.f32.mxu1 %vm49_vm0, %v1699_v36 }
 0x84a   :  { %v1700_v61 = vadd.f32 %v1962_v56, %v1692_v60 }
 0x84c   :  { %2146 = vmatmul.mubr.msk.f32.vlgmr.msra.gmra.mrb[22].mxu1 %vm49_vm0, %v1700_v61 }
 0x91f   :  { %v2147_v21 = vpop.f32.mrb[22].mxu1 }
 0x920   :  { %v1790_v22 = vadd.f32 %v2147_v21, %v1963_v20  ;;  %v1784_v23 = vpop.f32.mrb[23].mxu1 }
 0x921   :  { %v1785_v26 = vadd.f32 %v1963_v20, %v1784_v23 }
 0x922   :  { %v1796_v27 = vmul.f32 0.044715, %v1790_v22  ;;  %v1794_v42 = vmul.f32 0.5, %v1790_v22 }
 0x923   :  { %v1795_v28 = vmul.f32 0.044715, %v1785_v26  ;;  %v1793_v38 = vmul.f32 0.5, %v1785_v26 }
 0x924   :  { %v1798_v29 = vmul.f32 %v1796_v27, %v1790_v22 }
 0x925   :  { %v1797_v41 = vmul.f32 %v1795_v28, %v1785_v26 }
 0x926   :  { %v1800_v30 = vmul.f32 %v1798_v29, %v1790_v22 }
 0x927   :  { %v1799_v31 = vmul.f32 %v1797_v41, %v1785_v26 }
 0x928   :  { %v1802_v1 = vadd.f32 %v1800_v30, %v1790_v22 }
 0x929   :  { %v1801_v32 = vadd.f32 %v1799_v31, %v1785_v26 }
 0x92a   :  { %v1804_v0 = vmul.f32 0.7978846, %v1802_v1 }
 0x92b   :  { %v1803_v33 = vmul.f32 0.7978846, %v1801_v32 }
 0x92c   :  { %2298 = vtanh.f32 %v1804_v0 }
 0x92d   :  { %2300 = vtanh.f32 %v1803_v33 }
 0x936   :  { %v2299_v34 = vpop.eup %2298 }
 0x937   :  { %v2301_v35 = vpop.eup %2300  ;;  %v1808_v37 = vadd.f32 1.0, %v2299_v34 }
 0x938   :  { %v1807_v39 = vadd.f32 1.0, %v2301_v35 }
 0x939   :  { %v1810_v44 = vmul.f32 %v1808_v37, %v1794_v42 }
 0x93a   :  { %v1809_v43 = vmul.f32 %v1807_v39, %v1793_v38 }
 0x93c   :  { %2180 = vmatprep.mubr.f32.mxu0 %v1809_v43 }
 0x93d   :  { %2181 = vmatmul.mubr.f32.vlgmr.msra.gmra.mrb[14].mxu0 %v1810_v44 }
 0xa10   :  { %v2182_v46 = vpop.f32.mrb[14].mxu0 }
 0xa11   :  { %v1906_v47 = vadd.f32 %v2182_v46, %v1966_v45  ;;  %v1900_v48 = vpop.f32.mrb[15].mxu0 }
 0xa12   :  { %v1901_v49 = vadd.f32 %v1966_v45, %v1900_v48 }
 0xa13   :  { %v1910_v50 = vadd.f32 %v1906_v47, %v2622_v24 }
 0xa14   :  { %v1909_v51 = vadd.f32 %v1901_v49, %v2625_v25 }
 0xa15   :  { %1912 = vst.msk [vmem:[#allocation3 + $0x8] sm:$0xff] %vm49_vm0, %v1910_v50 }
 0xa16   :  { %1911 = vst.msk [vmem:[#allocation3] sm:$0xff] %vm49_vm0, %v1909_v51 }
 0xa17   :  { %2313 = shalt.err (!%p2310_p4)
}
 0xa18   :  { %s2314_s5 = scalar_lea.hbm %s2739_s13, 256 }
 0xa19   :  { %p2315_p5 = scmp.ne.s32.totalorder %s2739_s13, %s2314_s5  ;;  %p2318_p6 = scmp.lt.u32.totalorder %s2314_s5, %s2739_s13 }
 0xa1b   :  { %p2320_p7 = pnand %p2318_p6, %p2315_p5 }
 0xa1d   :  { %2323 = shalt.err (!%p2320_p7)
}
 0xa1e   :  { %s2344_s25 = smov 128  }
 0xa1f   :  { %1924 = dma.vmem_to_hbm [thread:$0]  %s1919_s21, 256, %s2739_s13, [#allocation4], %s2344_s25, %s2344_s25, %s2340_s14  }
 0xa20   :  { %2324 = dma.done.wait [#allocation4], 256  }
 0xa21   :  { %2325 = vsyncadd [#allocation4], 4294967040 }
 0xa22   :  { %1928 = vsyncpa [#allocation4], 1 }

</bundles_post_ra>
